<compile_context>
chip_gen: v6e
topology: v6e:2x2x1
jax: 0.10.0
libtpu: 0.0.40
codegen_flags: <defaults>
</compile_context>

<pallas_src>
import functools

import numpy as np
import jax
import jax.numpy as jnp
from jax.experimental import pallas as pl
from jax.experimental.pallas import tpu as pltpu

EPS = 1e-5
KH = KW = 3
STRIDE = 2
PAD = 1


def _out_dim(d):
    return (d + 2 * PAD - KH) // STRIDE + 1


def _build_gather(hin, win, hout, wout):
    """(9, hout*wout, hin*win) 0/1 matrices: G[t, m, p] = 1 iff output position m
    reads input position p under kernel tap t (row is all-zero if tap hits padding)."""
    g = np.zeros((KH * KW, hout * wout, hin * win), np.float32)
    for ki in range(KH):
        for kj in range(KW):
            t = ki * KW + kj
            for ho in range(hout):
                r = STRIDE * ho + ki - PAD
                if not (0 <= r < hin):
                    continue
                for wo in range(wout):
                    c = STRIDE * wo + kj - PAD
                    if 0 <= c < win:
                        g[t, ho * wout + wo, r * win + c] = 1.0
    return jnp.asarray(g)


# ----------------------------- fused Pallas kernel -----------------------------
def _fused_kernel(*refs, steps):
    # refs = (patches_ref, w1_ref, s1_ref, [per-layer refs ...], out_ref)
    p_ref, w1_ref, s1_ref = refs[0], refs[1], refs[2]
    out_ref = refs[-1]
    layer_refs = refs[3:-1]

    # Layer 1: host-side im2col patches -> single (M1, 27) @ (27, 32) matmul.
    a = jnp.maximum(
        jnp.dot(p_ref[0], w1_ref[...], preferred_element_type=jnp.float32)
        + s1_ref[...], 0.0)

    r = 0
    for kind, info, cin, cout in steps:          # statically unrolled over layers
        if kind == "gather":
            g_ref, w_ref, s_ref = layer_refs[r], layer_refs[r + 1], layer_refs[r + 2]
            r += 3
            # 9 independent gather matmuls (M_out, M_in) @ (M_in, Cin); G is 0/1
            # stored bf16 (lossless), promoted to f32 so the selection is exact.
            taps = [jnp.dot(g_ref[t].astype(jnp.float32), a,
                            preferred_element_type=jnp.float32)
                    for t in range(KH * KW)]
        else:  # "select": M_out == 1 -> taps are static row slices of `a` (or zero)
            w_ref, s_ref = layer_refs[r], layer_refs[r + 1]
            r += 2
            zero = jnp.zeros((1, cin), jnp.float32)
            taps = [zero if row is None else a[row:row + 1, :] for row in info]
        p = jnp.concatenate(taps, axis=1)        # (M_out, 9*Cin) lane-concat
        # one deep-K channel-mix matmul + folded BN shift/bias + ReLU
        a = jnp.maximum(
            jnp.dot(p, w_ref[...], preferred_element_type=jnp.float32)
            + s_ref[...], 0.0)

    out_ref[0] = a                               # lane-dense (M_last, 256) store


# ----------------------------- wrapper / builder -----------------------------
def make_forward(params, image_hw):
    """Bake conv/BN params + gather constants for a fixed input size and return a
    jitted NCHW -> NCHW forward pass that runs a single fused Pallas kernel."""
    h, w = image_hw
    n_layers = len(params)

    heights, widths = [h], [w]
    for _ in range(n_layers):
        heights.append(_out_dim(heights[-1]))
        widths.append(_out_dim(widths[-1]))

    # Fold BN scale into weights: Wstack[(t*Cin + c), o] = W[o, c, ki, kj] * scale[o]
    wstacks, shifts = [], []
    for (wt, bias, gamma, beta, mean, var) in params:
        cout, cin = wt.shape[0], wt.shape[1]
        scale = gamma / jnp.sqrt(var + EPS)
        wstack = (jnp.transpose(wt, (2, 3, 1, 0)).reshape(KH * KW * cin, cout)
                  * scale[None, :])
        shifts.append((beta + (bias - mean) * scale).reshape(1, cout))
        wstacks.append(wstack)

    cin0 = params[0][0].shape[1]
    h1, w1 = heights[1], widths[1]
    m1 = h1 * w1
    k1 = KH * KW * cin0

    operands = [wstacks[0], shifts[0]]
    in_specs_tail = [pl.BlockSpec(wstacks[0].shape, lambda b: (0, 0)),
                     pl.BlockSpec(shifts[0].shape, lambda b: (0, 0))]
    steps = []
    for l in range(1, n_layers):
        cout, cin = params[l][0].shape[0], params[l][0].shape[1]
        hin, win = heights[l], widths[l]
        hout, wout = heights[l + 1], widths[l + 1]
        if hout * wout == 1:
            # Single output position: tap t reads input row (ki-PAD, kj-PAD) or padding.
            rows = []
            for ki in range(KH):
                for kj in range(KW):
                    r, c = ki - PAD, kj - PAD
                    rows.append(r * win + c if (0 <= r < hin and 0 <= c < win) else None)
            steps.append(("select", tuple(rows), cin, cout))
        else:
            g = _build_gather(hin, win, hout, wout).astype(jnp.bfloat16)
            operands.append(g)
            in_specs_tail.append(pl.BlockSpec(g.shape, lambda b: (0, 0, 0)))
            steps.append(("gather", hout * wout, cin, cout))
        operands += [wstacks[l], shifts[l]]
        in_specs_tail += [pl.BlockSpec(wstacks[l].shape, lambda b: (0, 0)),
                          pl.BlockSpec(shifts[l].shape, lambda b: (0, 0))]

    clast = params[-1][0].shape[0]
    h_last, w_last = heights[-1], widths[-1]
    m_last = h_last * w_last
    kernel = functools.partial(_fused_kernel, steps=tuple(steps))

    @jax.jit
    def forward(x_nchw):
        n = x_nchw.shape[0]
        # Layer-1 im2col in XLA: NCHW -> NHWC, pad 1, stride-2 3x3 patches,
        # tap-major / channel-minor columns -> (N, M1, 27).
        x_nhwc = jnp.transpose(x_nchw, (0, 2, 3, 1))
        xp = jnp.pad(x_nhwc, ((0, 0), (PAD, PAD), (PAD, PAD), (0, 0)))
        taps = [xp[:, ki:ki + STRIDE * h1 - 1:STRIDE,
                   kj:kj + STRIDE * w1 - 1:STRIDE, :]
                for ki in range(KH) for kj in range(KW)]
        patches = jnp.concatenate(taps, axis=-1).reshape(n, m1, k1)

        out = pl.pallas_call(
            kernel,
            out_shape=jax.ShapeDtypeStruct((n, m_last, clast), jnp.float32),
            grid=(n,),
            in_specs=[pl.BlockSpec((1, m1, k1), lambda b: (b, 0, 0))] + in_specs_tail,
            out_specs=pl.BlockSpec((1, m_last, clast), lambda b: (b, 0, 0)),
            compiler_params=pltpu.CompilerParams(
                dimension_semantics=("parallel",)),
        )(patches, *operands)
        out = out.reshape(n, h_last, w_last, clast)
        return jnp.transpose(out, (0, 3, 1, 2))    # NHWC -> NCHW (PyTorch layout)

    return forward


# ----------------------------- reference (plain JAX, eval-mode BN) -----------------------------
def reference_forward(x_nchw, params):
    x = x_nchw
    for (wt, b, gamma, beta, mean, var) in params:
        x = jax.lax.conv_general_dilated(
            x, wt, window_strides=(STRIDE, STRIDE),
            padding=((PAD, PAD), (PAD, PAD)),
            dimension_numbers=("NCHW", "OIHW", "NCHW"))
        x = x + b[None, :, None, None]
        x = (x - mean[None, :, None, None]) / jnp.sqrt(var[None, :, None, None] + EPS)
        x = x * gamma[None, :, None, None] + beta[None, :, None, None]
        x = jnp.maximum(x, 0.0)
    return x


# ----------------------------- parameter init -----------------------------
def make_params(key):
    # Channel progression from the nn.Sequential: 3 -> 32 -> 64 -> 128 -> 256.
    chans = [(3, 32), (32, 64), (64, 128), (128, 256)]
    params = []
    for cin, cout in chans:
        key, kw, kb, kg, kbe, km, kv = jax.random.split(key, 7)
        w = 0.1 * jax.random.normal(kw, (cout, cin, KH, KW), jnp.float32)
        b = 0.05 * jax.random.normal(kb, (cout,), jnp.float32)
        gamma = 1.0 + 0.1 * jax.random.normal(kg, (cout,), jnp.float32)
        beta = 0.05 * jax.random.normal(kbe, (cout,), jnp.float32)
        mean = 0.05 * jax.random.normal(km, (cout,), jnp.float32)
        var = 1.0 + 0.1 * jnp.abs(jax.random.normal(kv, (cout,), jnp.float32))
        params.append((w, b, gamma, beta, mean, var))
    return tuple(params)


if __name__ == "__main__":
    key = jax.random.PRNGKey(0)
    k_in, k_p = jax.random.split(key)
    # Conv2d(3, ...) requires 3 input channels; NCHW like PyTorch.
    x = jax.random.normal(k_in, (2, 3, 16, 16), jnp.float32)
    params = make_params(k_p)

    forward = make_forward(params, (16, 16))
    out = jax.block_until_ready(forward(x))

    assert out.shape == (2, 256, 1, 1), out.shape  # 16 -> 8 -> 4 -> 2 -> 1 spatially

    ref = reference_forward(x, params)
    max_err = float(jnp.max(jnp.abs(out - ref)))
    assert jnp.allclose(out, ref, atol=2e-4, rtol=2e-4), max_err

    print("KERNEL_OK")
</pallas_src>

<mosaic_0001>
module attributes {stable_mosaic.version = 11 : i64} {
  func.func @_fused_kernel(%arg0: i32, %arg1: memref<1x64x27xf32, #tpu.memory_space<vmem>>, %arg2: memref<27x32xf32, #tpu.memory_space<vmem>>, %arg3: memref<1x32xf32, #tpu.memory_space<vmem>>, %arg4: memref<9x16x64xbf16, #tpu.memory_space<vmem>>, %arg5: memref<288x64xf32, #tpu.memory_space<vmem>>, %arg6: memref<1x64xf32, #tpu.memory_space<vmem>>, %arg7: memref<9x4x16xbf16, #tpu.memory_space<vmem>>, %arg8: memref<576x128xf32, #tpu.memory_space<vmem>>, %arg9: memref<1x128xf32, #tpu.memory_space<vmem>>, %arg10: memref<1152x256xf32, #tpu.memory_space<vmem>>, %arg11: memref<1x256xf32, #tpu.memory_space<vmem>>, %arg12: memref<1x1x256xf32, #tpu.memory_space<vmem>>) attributes {dimension_semantics = [#tpu.dimension_semantics<parallel>], iteration_bounds = array<i64: 2>, scalar_prefetch = 0 : i64, scratch_operands = 0 : i64, tpu.core_type = #tpu.core_type<tc>, window_params = [{transform_indices = @transform_0, window_bounds = array<i64: 1, 64, 27>}, {pipeline_mode = #tpu.pipeline_mode<synchronous>, transform_indices = @transform_1, window_bounds = array<i64: 27, 32>}, {pipeline_mode = #tpu.pipeline_mode<synchronous>, transform_indices = @transform_2, window_bounds = array<i64: 1, 32>}, {pipeline_mode = #tpu.pipeline_mode<synchronous>, transform_indices = @transform_3, window_bounds = array<i64: 9, 16, 64>}, {pipeline_mode = #tpu.pipeline_mode<synchronous>, transform_indices = @transform_4, window_bounds = array<i64: 288, 64>}, {pipeline_mode = #tpu.pipeline_mode<synchronous>, transform_indices = @transform_5, window_bounds = array<i64: 1, 64>}, {pipeline_mode = #tpu.pipeline_mode<synchronous>, transform_indices = @transform_6, window_bounds = array<i64: 9, 4, 16>}, {pipeline_mode = #tpu.pipeline_mode<synchronous>, transform_indices = @transform_7, window_bounds = array<i64: 576, 128>}, {pipeline_mode = #tpu.pipeline_mode<synchronous>, transform_indices = @transform_8, window_bounds = array<i64: 1, 128>}, {pipeline_mode = #tpu.pipeline_mode<synchronous>, transform_indices = @transform_9, window_bounds = array<i64: 1152, 256>}, {pipeline_mode = #tpu.pipeline_mode<synchronous>, transform_indices = @transform_10, window_bounds = array<i64: 1, 256>}, {transform_indices = @transform_11, window_bounds = array<i64: 1, 1, 256>}]} {
    %c0 = arith.constant 0 : index
    %c0_0 = arith.constant 0 : index
    %c0_1 = arith.constant 0 : index
    %0 = vector.load %arg1[%c0, %c0_0, %c0_1] : memref<1x64x27xf32, #tpu.memory_space<vmem>>, vector<1x64x27xf32>
    %1 = vector.shape_cast %0 : vector<1x64x27xf32> to vector<64x27xf32>
    %c0_2 = arith.constant 0 : index
    %c0_3 = arith.constant 0 : index
    %2 = vector.load %arg2[%c0_2, %c0_3] : memref<27x32xf32, #tpu.memory_space<vmem>>, vector<27x32xf32>
    %cst = arith.constant dense<0.000000e+00> : vector<64x32xf32>
    %3 = tpu.matmul %1, %2, %cst {dimension_numbers = #tpu.dot_dimension_numbers<[1], [0], [0], [1], [0, 0, 1, 1], [], []>} : vector<64x27xf32>, vector<27x32xf32>, vector<64x32xf32> -> vector<64x32xf32>
    %c0_4 = arith.constant 0 : index
    %c0_5 = arith.constant 0 : index
    %4 = vector.load %arg3[%c0_4, %c0_5] : memref<1x32xf32, #tpu.memory_space<vmem>>, vector<1x32xf32>
    %5 = vector.broadcast %4 : vector<1x32xf32> to vector<64x32xf32>
    %6 = arith.addf %3, %5 : vector<64x32xf32>
    %cst_6 = arith.constant 0.000000e+00 : f32
    %7 = vector.broadcast %cst_6 : f32 to vector<64x32xf32>
    %8 = arith.maximumf %6, %7 : vector<64x32xf32>
    %c0_7 = arith.constant 0 : index
    %c0_8 = arith.constant 0 : index
    %c0_9 = arith.constant 0 : index
    %9 = vector.load %arg4[%c0_7, %c0_8, %c0_9] : memref<9x16x64xbf16, #tpu.memory_space<vmem>>, vector<1x16x64xbf16>
    %10 = vector.shape_cast %9 : vector<1x16x64xbf16> to vector<16x64xbf16>
    %11 = arith.extf %10 : vector<16x64xbf16> to vector<16x64xf32>
    %cst_10 = arith.constant dense<0.000000e+00> : vector<16x32xf32>
    %12 = tpu.matmul %11, %8, %cst_10 {dimension_numbers = #tpu.dot_dimension_numbers<[1], [0], [0], [1], [0, 0, 1, 1], [], []>} : vector<16x64xf32>, vector<64x32xf32>, vector<16x32xf32> -> vector<16x32xf32>
    %c1 = arith.constant 1 : index
    %c0_11 = arith.constant 0 : index
    %c0_12 = arith.constant 0 : index
    %13 = vector.load %arg4[%c1, %c0_11, %c0_12] : memref<9x16x64xbf16, #tpu.memory_space<vmem>>, vector<1x16x64xbf16>
    %14 = vector.shape_cast %13 : vector<1x16x64xbf16> to vector<16x64xbf16>
    %15 = arith.extf %14 : vector<16x64xbf16> to vector<16x64xf32>
    %cst_13 = arith.constant dense<0.000000e+00> : vector<16x32xf32>
    %16 = tpu.matmul %15, %8, %cst_13 {dimension_numbers = #tpu.dot_dimension_numbers<[1], [0], [0], [1], [0, 0, 1, 1], [], []>} : vector<16x64xf32>, vector<64x32xf32>, vector<16x32xf32> -> vector<16x32xf32>
    %c2 = arith.constant 2 : index
    %c0_14 = arith.constant 0 : index
    %c0_15 = arith.constant 0 : index
    %17 = vector.load %arg4[%c2, %c0_14, %c0_15] : memref<9x16x64xbf16, #tpu.memory_space<vmem>>, vector<1x16x64xbf16>
    %18 = vector.shape_cast %17 : vector<1x16x64xbf16> to vector<16x64xbf16>
    %19 = arith.extf %18 : vector<16x64xbf16> to vector<16x64xf32>
    %cst_16 = arith.constant dense<0.000000e+00> : vector<16x32xf32>
    %20 = tpu.matmul %19, %8, %cst_16 {dimension_numbers = #tpu.dot_dimension_numbers<[1], [0], [0], [1], [0, 0, 1, 1], [], []>} : vector<16x64xf32>, vector<64x32xf32>, vector<16x32xf32> -> vector<16x32xf32>
    %c3 = arith.constant 3 : index
    %c0_17 = arith.constant 0 : index
    %c0_18 = arith.constant 0 : index
    %21 = vector.load %arg4[%c3, %c0_17, %c0_18] : memref<9x16x64xbf16, #tpu.memory_space<vmem>>, vector<1x16x64xbf16>
    %22 = vector.shape_cast %21 : vector<1x16x64xbf16> to vector<16x64xbf16>
    %23 = arith.extf %22 : vector<16x64xbf16> to vector<16x64xf32>
    %cst_19 = arith.constant dense<0.000000e+00> : vector<16x32xf32>
    %24 = tpu.matmul %23, %8, %cst_19 {dimension_numbers = #tpu.dot_dimension_numbers<[1], [0], [0], [1], [0, 0, 1, 1], [], []>} : vector<16x64xf32>, vector<64x32xf32>, vector<16x32xf32> -> vector<16x32xf32>
    %c4 = arith.constant 4 : index
    %c0_20 = arith.constant 0 : index
    %c0_21 = arith.constant 0 : index
    %25 = vector.load %arg4[%c4, %c0_20, %c0_21] : memref<9x16x64xbf16, #tpu.memory_space<vmem>>, vector<1x16x64xbf16>
    %26 = vector.shape_cast %25 : vector<1x16x64xbf16> to vector<16x64xbf16>
    %27 = arith.extf %26 : vector<16x64xbf16> to vector<16x64xf32>
    %cst_22 = arith.constant dense<0.000000e+00> : vector<16x32xf32>
    %28 = tpu.matmul %27, %8, %cst_22 {dimension_numbers = #tpu.dot_dimension_numbers<[1], [0], [0], [1], [0, 0, 1, 1], [], []>} : vector<16x64xf32>, vector<64x32xf32>, vector<16x32xf32> -> vector<16x32xf32>
    %c5 = arith.constant 5 : index
    %c0_23 = arith.constant 0 : index
    %c0_24 = arith.constant 0 : index
    %29 = vector.load %arg4[%c5, %c0_23, %c0_24] : memref<9x16x64xbf16, #tpu.memory_space<vmem>>, vector<1x16x64xbf16>
    %30 = vector.shape_cast %29 : vector<1x16x64xbf16> to vector<16x64xbf16>
    %31 = arith.extf %30 : vector<16x64xbf16> to vector<16x64xf32>
    %cst_25 = arith.constant dense<0.000000e+00> : vector<16x32xf32>
    %32 = tpu.matmul %31, %8, %cst_25 {dimension_numbers = #tpu.dot_dimension_numbers<[1], [0], [0], [1], [0, 0, 1, 1], [], []>} : vector<16x64xf32>, vector<64x32xf32>, vector<16x32xf32> -> vector<16x32xf32>
    %c6 = arith.constant 6 : index
    %c0_26 = arith.constant 0 : index
    %c0_27 = arith.constant 0 : index
    %33 = vector.load %arg4[%c6, %c0_26, %c0_27] : memref<9x16x64xbf16, #tpu.memory_space<vmem>>, vector<1x16x64xbf16>
    %34 = vector.shape_cast %33 : vector<1x16x64xbf16> to vector<16x64xbf16>
    %35 = arith.extf %34 : vector<16x64xbf16> to vector<16x64xf32>
    %cst_28 = arith.constant dense<0.000000e+00> : vector<16x32xf32>
    %36 = tpu.matmul %35, %8, %cst_28 {dimension_numbers = #tpu.dot_dimension_numbers<[1], [0], [0], [1], [0, 0, 1, 1], [], []>} : vector<16x64xf32>, vector<64x32xf32>, vector<16x32xf32> -> vector<16x32xf32>
    %c7 = arith.constant 7 : index
    %c0_29 = arith.constant 0 : index
    %c0_30 = arith.constant 0 : index
    %37 = vector.load %arg4[%c7, %c0_29, %c0_30] : memref<9x16x64xbf16, #tpu.memory_space<vmem>>, vector<1x16x64xbf16>
    %38 = vector.shape_cast %37 : vector<1x16x64xbf16> to vector<16x64xbf16>
    %39 = arith.extf %38 : vector<16x64xbf16> to vector<16x64xf32>
    %cst_31 = arith.constant dense<0.000000e+00> : vector<16x32xf32>
    %40 = tpu.matmul %39, %8, %cst_31 {dimension_numbers = #tpu.dot_dimension_numbers<[1], [0], [0], [1], [0, 0, 1, 1], [], []>} : vector<16x64xf32>, vector<64x32xf32>, vector<16x32xf32> -> vector<16x32xf32>
    %c8 = arith.constant 8 : index
    %c0_32 = arith.constant 0 : index
    %c0_33 = arith.constant 0 : index
    %41 = vector.load %arg4[%c8, %c0_32, %c0_33] : memref<9x16x64xbf16, #tpu.memory_space<vmem>>, vector<1x16x64xbf16>
    %42 = vector.shape_cast %41 : vector<1x16x64xbf16> to vector<16x64xbf16>
    %43 = arith.extf %42 : vector<16x64xbf16> to vector<16x64xf32>
    %cst_34 = arith.constant dense<0.000000e+00> : vector<16x32xf32>
    %44 = tpu.matmul %43, %8, %cst_34 {dimension_numbers = #tpu.dot_dimension_numbers<[1], [0], [0], [1], [0, 0, 1, 1], [], []>} : vector<16x64xf32>, vector<64x32xf32>, vector<16x32xf32> -> vector<16x32xf32>
    %45 = tpu.concatenate %12, %16, %20, %24, %28, %32, %36, %40, %44 in 1 : vector<16x32xf32>, vector<16x32xf32>, vector<16x32xf32>, vector<16x32xf32>, vector<16x32xf32>, vector<16x32xf32>, vector<16x32xf32>, vector<16x32xf32>, vector<16x32xf32> -> vector<16x288xf32>
    %c0_35 = arith.constant 0 : index
    %c0_36 = arith.constant 0 : index
    %46 = vector.load %arg5[%c0_35, %c0_36] : memref<288x64xf32, #tpu.memory_space<vmem>>, vector<288x64xf32>
    %cst_37 = arith.constant dense<0.000000e+00> : vector<16x64xf32>
    %47 = tpu.matmul %45, %46, %cst_37 {dimension_numbers = #tpu.dot_dimension_numbers<[1], [0], [0], [1], [0, 0, 1, 1], [], []>} : vector<16x288xf32>, vector<288x64xf32>, vector<16x64xf32> -> vector<16x64xf32>
    %c0_38 = arith.constant 0 : index
    %c0_39 = arith.constant 0 : index
    %48 = vector.load %arg6[%c0_38, %c0_39] : memref<1x64xf32, #tpu.memory_space<vmem>>, vector<1x64xf32>
    %49 = vector.broadcast %48 : vector<1x64xf32> to vector<16x64xf32>
    %50 = arith.addf %47, %49 : vector<16x64xf32>
    %cst_40 = arith.constant 0.000000e+00 : f32
    %51 = vector.broadcast %cst_40 : f32 to vector<16x64xf32>
    %52 = arith.maximumf %50, %51 : vector<16x64xf32>
    %c0_41 = arith.constant 0 : index
    %c0_42 = arith.constant 0 : index
    %c0_43 = arith.constant 0 : index
    %53 = vector.load %arg7[%c0_41, %c0_42, %c0_43] : memref<9x4x16xbf16, #tpu.memory_space<vmem>>, vector<1x4x16xbf16>
    %54 = vector.shape_cast %53 : vector<1x4x16xbf16> to vector<4x16xbf16>
    %55 = arith.extf %54 : vector<4x16xbf16> to vector<4x16xf32>
    %cst_44 = arith.constant dense<0.000000e+00> : vector<4x64xf32>
    %56 = tpu.matmul %55, %52, %cst_44 {dimension_numbers = #tpu.dot_dimension_numbers<[1], [0], [0], [1], [0, 0, 1, 1], [], []>} : vector<4x16xf32>, vector<16x64xf32>, vector<4x64xf32> -> vector<4x64xf32>
    %c1_45 = arith.constant 1 : index
    %c0_46 = arith.constant 0 : index
    %c0_47 = arith.constant 0 : index
    %57 = vector.load %arg7[%c1_45, %c0_46, %c0_47] : memref<9x4x16xbf16, #tpu.memory_space<vmem>>, vector<1x4x16xbf16>
    %58 = vector.shape_cast %57 : vector<1x4x16xbf16> to vector<4x16xbf16>
    %59 = arith.extf %58 : vector<4x16xbf16> to vector<4x16xf32>
    %cst_48 = arith.constant dense<0.000000e+00> : vector<4x64xf32>
    %60 = tpu.matmul %59, %52, %cst_48 {dimension_numbers = #tpu.dot_dimension_numbers<[1], [0], [0], [1], [0, 0, 1, 1], [], []>} : vector<4x16xf32>, vector<16x64xf32>, vector<4x64xf32> -> vector<4x64xf32>
    %c2_49 = arith.constant 2 : index
    %c0_50 = arith.constant 0 : index
    %c0_51 = arith.constant 0 : index
    %61 = vector.load %arg7[%c2_49, %c0_50, %c0_51] : memref<9x4x16xbf16, #tpu.memory_space<vmem>>, vector<1x4x16xbf16>
    %62 = vector.shape_cast %61 : vector<1x4x16xbf16> to vector<4x16xbf16>
    %63 = arith.extf %62 : vector<4x16xbf16> to vector<4x16xf32>
    %cst_52 = arith.constant dense<0.000000e+00> : vector<4x64xf32>
    %64 = tpu.matmul %63, %52, %cst_52 {dimension_numbers = #tpu.dot_dimension_numbers<[1], [0], [0], [1], [0, 0, 1, 1], [], []>} : vector<4x16xf32>, vector<16x64xf32>, vector<4x64xf32> -> vector<4x64xf32>
    %c3_53 = arith.constant 3 : index
    %c0_54 = arith.constant 0 : index
    %c0_55 = arith.constant 0 : index
    %65 = vector.load %arg7[%c3_53, %c0_54, %c0_55] : memref<9x4x16xbf16, #tpu.memory_space<vmem>>, vector<1x4x16xbf16>
    %66 = vector.shape_cast %65 : vector<1x4x16xbf16> to vector<4x16xbf16>
    %67 = arith.extf %66 : vector<4x16xbf16> to vector<4x16xf32>
    %cst_56 = arith.constant dense<0.000000e+00> : vector<4x64xf32>
    %68 = tpu.matmul %67, %52, %cst_56 {dimension_numbers = #tpu.dot_dimension_numbers<[1], [0], [0], [1], [0, 0, 1, 1], [], []>} : vector<4x16xf32>, vector<16x64xf32>, vector<4x64xf32> -> vector<4x64xf32>
    %c4_57 = arith.constant 4 : index
    %c0_58 = arith.constant 0 : index
    %c0_59 = arith.constant 0 : index
    %69 = vector.load %arg7[%c4_57, %c0_58, %c0_59] : memref<9x4x16xbf16, #tpu.memory_space<vmem>>, vector<1x4x16xbf16>
    %70 = vector.shape_cast %69 : vector<1x4x16xbf16> to vector<4x16xbf16>
    %71 = arith.extf %70 : vector<4x16xbf16> to vector<4x16xf32>
    %cst_60 = arith.constant dense<0.000000e+00> : vector<4x64xf32>
    %72 = tpu.matmul %71, %52, %cst_60 {dimension_numbers = #tpu.dot_dimension_numbers<[1], [0], [0], [1], [0, 0, 1, 1], [], []>} : vector<4x16xf32>, vector<16x64xf32>, vector<4x64xf32> -> vector<4x64xf32>
    %c5_61 = arith.constant 5 : index
    %c0_62 = arith.constant 0 : index
    %c0_63 = arith.constant 0 : index
    %73 = vector.load %arg7[%c5_61, %c0_62, %c0_63] : memref<9x4x16xbf16, #tpu.memory_space<vmem>>, vector<1x4x16xbf16>
    %74 = vector.shape_cast %73 : vector<1x4x16xbf16> to vector<4x16xbf16>
    %75 = arith.extf %74 : vector<4x16xbf16> to vector<4x16xf32>
    %cst_64 = arith.constant dense<0.000000e+00> : vector<4x64xf32>
    %76 = tpu.matmul %75, %52, %cst_64 {dimension_numbers = #tpu.dot_dimension_numbers<[1], [0], [0], [1], [0, 0, 1, 1], [], []>} : vector<4x16xf32>, vector<16x64xf32>, vector<4x64xf32> -> vector<4x64xf32>
    %c6_65 = arith.constant 6 : index
    %c0_66 = arith.constant 0 : index
    %c0_67 = arith.constant 0 : index
    %77 = vector.load %arg7[%c6_65, %c0_66, %c0_67] : memref<9x4x16xbf16, #tpu.memory_space<vmem>>, vector<1x4x16xbf16>
    %78 = vector.shape_cast %77 : vector<1x4x16xbf16> to vector<4x16xbf16>
    %79 = arith.extf %78 : vector<4x16xbf16> to vector<4x16xf32>
    %cst_68 = arith.constant dense<0.000000e+00> : vector<4x64xf32>
    %80 = tpu.matmul %79, %52, %cst_68 {dimension_numbers = #tpu.dot_dimension_numbers<[1], [0], [0], [1], [0, 0, 1, 1], [], []>} : vector<4x16xf32>, vector<16x64xf32>, vector<4x64xf32> -> vector<4x64xf32>
    %c7_69 = arith.constant 7 : index
    %c0_70 = arith.constant 0 : index
    %c0_71 = arith.constant 0 : index
    %81 = vector.load %arg7[%c7_69, %c0_70, %c0_71] : memref<9x4x16xbf16, #tpu.memory_space<vmem>>, vector<1x4x16xbf16>
    %82 = vector.shape_cast %81 : vector<1x4x16xbf16> to vector<4x16xbf16>
    %83 = arith.extf %82 : vector<4x16xbf16> to vector<4x16xf32>
    %cst_72 = arith.constant dense<0.000000e+00> : vector<4x64xf32>
    %84 = tpu.matmul %83, %52, %cst_72 {dimension_numbers = #tpu.dot_dimension_numbers<[1], [0], [0], [1], [0, 0, 1, 1], [], []>} : vector<4x16xf32>, vector<16x64xf32>, vector<4x64xf32> -> vector<4x64xf32>
    %c8_73 = arith.constant 8 : index
    %c0_74 = arith.constant 0 : index
    %c0_75 = arith.constant 0 : index
    %85 = vector.load %arg7[%c8_73, %c0_74, %c0_75] : memref<9x4x16xbf16, #tpu.memory_space<vmem>>, vector<1x4x16xbf16>
    %86 = vector.shape_cast %85 : vector<1x4x16xbf16> to vector<4x16xbf16>
    %87 = arith.extf %86 : vector<4x16xbf16> to vector<4x16xf32>
    %cst_76 = arith.constant dense<0.000000e+00> : vector<4x64xf32>
    %88 = tpu.matmul %87, %52, %cst_76 {dimension_numbers = #tpu.dot_dimension_numbers<[1], [0], [0], [1], [0, 0, 1, 1], [], []>} : vector<4x16xf32>, vector<16x64xf32>, vector<4x64xf32> -> vector<4x64xf32>
    %89 = tpu.concatenate %56, %60, %64, %68, %72, %76, %80, %84, %88 in 1 : vector<4x64xf32>, vector<4x64xf32>, vector<4x64xf32>, vector<4x64xf32>, vector<4x64xf32>, vector<4x64xf32>, vector<4x64xf32>, vector<4x64xf32>, vector<4x64xf32> -> vector<4x576xf32>
    %c0_77 = arith.constant 0 : index
    %c0_78 = arith.constant 0 : index
    %90 = vector.load %arg8[%c0_77, %c0_78] : memref<576x128xf32, #tpu.memory_space<vmem>>, vector<576x128xf32>
    %cst_79 = arith.constant dense<0.000000e+00> : vector<4x128xf32>
    %91 = tpu.matmul %89, %90, %cst_79 {dimension_numbers = #tpu.dot_dimension_numbers<[1], [0], [0], [1], [0, 0, 1, 1], [], []>} : vector<4x576xf32>, vector<576x128xf32>, vector<4x128xf32> -> vector<4x128xf32>
    %c0_80 = arith.constant 0 : index
    %c0_81 = arith.constant 0 : index
    %92 = vector.load %arg9[%c0_80, %c0_81] : memref<1x128xf32, #tpu.memory_space<vmem>>, vector<1x128xf32>
    %93 = vector.broadcast %92 : vector<1x128xf32> to vector<4x128xf32>
    %94 = arith.addf %91, %93 : vector<4x128xf32>
    %cst_82 = arith.constant 0.000000e+00 : f32
    %95 = vector.broadcast %cst_82 : f32 to vector<4x128xf32>
    %96 = arith.maximumf %94, %95 : vector<4x128xf32>
    %cst_83 = arith.constant 0.000000e+00 : f32
    %97 = vector.broadcast %cst_83 : f32 to vector<1x128xf32>
    %98 = vector.extract_strided_slice %96 {offsets = [0, 0], sizes = [1, 128], strides = [1, 1]} : vector<4x128xf32> to vector<1x128xf32>
    %99 = vector.extract_strided_slice %96 {offsets = [1, 0], sizes = [1, 128], strides = [1, 1]} : vector<4x128xf32> to vector<1x128xf32>
    %100 = vector.extract_strided_slice %96 {offsets = [2, 0], sizes = [1, 128], strides = [1, 1]} : vector<4x128xf32> to vector<1x128xf32>
    %101 = vector.extract_strided_slice %96 {offsets = [3, 0], sizes = [1, 128], strides = [1, 1]} : vector<4x128xf32> to vector<1x128xf32>
    %102 = tpu.concatenate %97, %97, %97, %97, %98, %99, %97, %100, %101 in 1 : vector<1x128xf32>, vector<1x128xf32>, vector<1x128xf32>, vector<1x128xf32>, vector<1x128xf32>, vector<1x128xf32>, vector<1x128xf32>, vector<1x128xf32>, vector<1x128xf32> -> vector<1x1152xf32>
    %c0_84 = arith.constant 0 : index
    %c0_85 = arith.constant 0 : index
    %103 = vector.load %arg10[%c0_84, %c0_85] : memref<1152x256xf32, #tpu.memory_space<vmem>>, vector<1152x256xf32>
    %cst_86 = arith.constant dense<0.000000e+00> : vector<1x256xf32>
    %104 = tpu.matmul %102, %103, %cst_86 {dimension_numbers = #tpu.dot_dimension_numbers<[1], [0], [0], [1], [0, 0, 1, 1], [], []>} : vector<1x1152xf32>, vector<1152x256xf32>, vector<1x256xf32> -> vector<1x256xf32>
    %c0_87 = arith.constant 0 : index
    %c0_88 = arith.constant 0 : index
    %105 = vector.load %arg11[%c0_87, %c0_88] : memref<1x256xf32, #tpu.memory_space<vmem>>, vector<1x256xf32>
    %106 = arith.addf %104, %105 : vector<1x256xf32>
    %cst_89 = arith.constant 0.000000e+00 : f32
    %107 = vector.broadcast %cst_89 : f32 to vector<1x256xf32>
    %108 = arith.maximumf %106, %107 : vector<1x256xf32>
    %c0_90 = arith.constant 0 : index
    %c0_91 = arith.constant 0 : index
    %c0_92 = arith.constant 0 : index
    %109 = vector.load %arg12[%c0_90, %c0_91, %c0_92] : memref<1x1x256xf32, #tpu.memory_space<vmem>>, vector<1x1x256xf32>
    %110 = vector.shape_cast %109 : vector<1x1x256xf32> to vector<1x256xf32>
    %111 = vector.shape_cast %108 : vector<1x256xf32> to vector<1x1x256xf32>
    tpu.vector_store %arg12[%c0_90, %c0_91, %c0_92], %111 {strides = array<i32>} : memref<1x1x256xf32, #tpu.memory_space<vmem>>, vector<1x1x256xf32>,
    return
  }
  func.func @transform_0(%arg0: i32) -> (i32, i32, i32) {
    %c0_i32 = arith.constant 0 : i32
    %c0_i32_0 = arith.constant 0 : i32
    %c0_i32_1 = arith.constant 0 : i32
    return %arg0, %c0_i32, %c0_i32_0 : i32, i32, i32
  }
  func.func @transform_1(%arg0: i32) -> (i32, i32) {
    %c0_i32 = arith.constant 0 : i32
    %c0_i32_0 = arith.constant 0 : i32
    %c0_i32_1 = arith.constant 0 : i32
    return %c0_i32, %c0_i32_0 : i32, i32
  }
  func.func @transform_2(%arg0: i32) -> (i32, i32) {
    %c0_i32 = arith.constant 0 : i32
    %c0_i32_0 = arith.constant 0 : i32
    %c0_i32_1 = arith.constant 0 : i32
    return %c0_i32, %c0_i32_0 : i32, i32
  }
  func.func @transform_3(%arg0: i32) -> (i32, i32, i32) {
    %c0_i32 = arith.constant 0 : i32
    %c0_i32_0 = arith.constant 0 : i32
    %c0_i32_1 = arith.constant 0 : i32
    %c0_i32_2 = arith.constant 0 : i32
    return %c0_i32, %c0_i32_0, %c0_i32_1 : i32, i32, i32
  }
  func.func @transform_4(%arg0: i32) -> (i32, i32) {
    %c0_i32 = arith.constant 0 : i32
    %c0_i32_0 = arith.constant 0 : i32
    %c0_i32_1 = arith.constant 0 : i32
    return %c0_i32, %c0_i32_0 : i32, i32
  }
  func.func @transform_5(%arg0: i32) -> (i32, i32) {
    %c0_i32 = arith.constant 0 : i32
    %c0_i32_0 = arith.constant 0 : i32
    %c0_i32_1 = arith.constant 0 : i32
    return %c0_i32, %c0_i32_0 : i32, i32
  }
  func.func @transform_6(%arg0: i32) -> (i32, i32, i32) {
    %c0_i32 = arith.constant 0 : i32
    %c0_i32_0 = arith.constant 0 : i32
    %c0_i32_1 = arith.constant 0 : i32
    %c0_i32_2 = arith.constant 0 : i32
    return %c0_i32, %c0_i32_0, %c0_i32_1 : i32, i32, i32
  }
  func.func @transform_7(%arg0: i32) -> (i32, i32) {
    %c0_i32 = arith.constant 0 : i32
    %c0_i32_0 = arith.constant 0 : i32
    %c0_i32_1 = arith.constant 0 : i32
    return %c0_i32, %c0_i32_0 : i32, i32
  }
  func.func @transform_8(%arg0: i32) -> (i32, i32) {
    %c0_i32 = arith.constant 0 : i32
    %c0_i32_0 = arith.constant 0 : i32
    %c0_i32_1 = arith.constant 0 : i32
    return %c0_i32, %c0_i32_0 : i32, i32
  }
  func.func @transform_9(%arg0: i32) -> (i32, i32) {
    %c0_i32 = arith.constant 0 : i32
    %c0_i32_0 = arith.constant 0 : i32
    %c0_i32_1 = arith.constant 0 : i32
    return %c0_i32, %c0_i32_0 : i32, i32
  }
  func.func @transform_10(%arg0: i32) -> (i32, i32) {
    %c0_i32 = arith.constant 0 : i32
    %c0_i32_0 = arith.constant 0 : i32
    %c0_i32_1 = arith.constant 0 : i32
    return %c0_i32, %c0_i32_0 : i32, i32
  }
  func.func @transform_11(%arg0: i32) -> (i32, i32, i32) {
    %c0_i32 = arith.constant 0 : i32
    %c0_i32_0 = arith.constant 0 : i32
    %c0_i32_1 = arith.constant 0 : i32
    return %arg0, %c0_i32, %c0_i32_0 : i32, i32, i32
  }
}

</mosaic_0001>

<bundles_post_ra>
// kernel: forward.1
= control target key start
LH: loop header
LB: loop body
LE: loop exit
PB: predicated region body
PF: predicated region fallthrough
CT: control target
= control target key end

     0   :  { %s5886_s0 = inlined_call_operand.vmem [shape: f32[2,64,27], index: 0, kind: input, shape index: {}]   ;;  %s5887_s1 = inlined_call_operand.vmem [shape: f32[27,32], index: 1, kind: input, shape index: {}]   ;;  %s5888_s2 = inlined_call_operand.vmem [shape: f32[1,32], index: 2, kind: input, shape index: {}]   ;;  %s5889_s3 = inlined_call_operand.vmem [shape: bf16[9,16,64], index: 3, kind: input, shape index: {}]   ;;  %s5890_s4 = inlined_call_operand.vmem [shape: f32[288,64], index: 4, kind: input, shape index: {}]   ;;  %s5891_s5 = inlined_call_operand.vmem [shape: f32[1,64], index: 5, kind: input, shape index: {}]   ;;  %s5892_s6 = inlined_call_operand.vmem [shape: bf16[9,4,16], index: 6, kind: input, shape index: {}]   ;;  %s5893_s7 = inlined_call_operand.vmem [shape: f32[576,128], index: 7, kind: input, shape index: {}]   ;;  %s5894_s8 = inlined_call_operand.vmem [shape: f32[1,128], index: 8, kind: input, shape index: {}]   ;;  %s5895_s9 = inlined_call_operand.vmem [shape: f32[1152,256], index: 9, kind: input, shape index: {}]   ;;  %s5896_s10 = inlined_call_operand.vmem [shape: f32[1,256], index: 10, kind: input, shape index: {}]   ;;  %s5897_s11 = inlined_call_operand.hbm [shape: f32[2,1,256], index: 11, kind: output, shape index: {}]  }
   0x1   :  { %5900 = sst [smem:[#allocation5_spill]] %s5886_s0 }
   0x2   :  { %5901 = sst [smem:[#allocation6_spill]] %s5887_s1 }
   0x3   :  { %16 = vsyncpa [#allocation3], 0 }
   0x4   :  { %18 = vsyncpa [#allocation3 + $0x1], 0  ;;  %s4215_s17 = smov 0   ;;  %s4217_s18 = smov 0  }
   0x5   :  { %s4219_s19 = smov 0   ;;  %s4221_s20 = smov 0  }
   0x6 LB: > { %s4236_s21 = sadd.s32 4294967295, %s4146_s20   ;;  %s3341_s22 = sadd.s32 4294967294, %s4146_s20   ;;  %s4146_s20 = sphi %s4221_s20, %s5910_s20   ;;  %s4142_s19 = sphi %s4219_s19, %s5909_s19   ;;  %s4138_s18 = sphi %s4217_s18, %s5908_s18   ;;  %s4134_s17 = sphi %s4215_s17, %s5907_s17  }
   0x7   : > { %s4240_s23 = sadd.s32 1, %s4146_s20   ;;  %s267_s24 = sadd.s32 1, %s4142_s19 }
   0x8   : > { %s264_s25 = ssub.s32 %s4146_s20, %s4240_s23  ;;  %p277_p0 = scmp.ne.s32.totalorder %s4142_s19, %s4138_s18 }
   0x9   : > { %p265_p1 = scmp.eq.s32.totalorder %s264_s25, 0  ;;  %p278_p2 = scmp.eq.s32.totalorder %s4236_s21, 1 }
   0xa   : > { %p283_p3 = scmp.ne.s32.totalorder %s4138_s18, %s4134_s17  ;;  %p284_p4 = scmp.eq.s32.totalorder %s3341_s22, 1 }
   0xb   : > { %s4251_s26 = scalar_select %p265_p1, %s4142_s19, %s267_s24  }
   0xc   : > { %p4253_p5 = por %p278_p2, %p277_p0  ;;  %p4257_p6 = por %p284_p4, %p283_p3 }
   0xd   : > { %p3344_p7 = scmp.ge.s32.totalorder %s4146_s20, 1  ;;  %p340_p8 = scmp.lt.s32.totalorder %s4146_s20, 3 }
   0xf   : > { %p341_p9 = pnand %p3344_p7, %p340_p8 }
  0x10   : > { %s5904_s1 = sld [smem:[#allocation6_spill]] (!%p341_p9)  ;;  %p380_p10 = scmp.lt.s32.totalorder (!%p341_p9), %s4236_s21, 1 }
  0x11   : > { %344 = sbr.rel (%p341_p9) target bundleno = 1631 (0x65f), region = 64  ;;  %s5905_s0 = sld [smem:[#allocation5_spill]] (!%p341_p9) }
  0x12   : > { %s4148_s22 = smov (!%p341_p9), 32   ;;  %s4149_s29 = smov (!%p341_p9), 96  }
  0x13   : > { %s5898_s30 = smov (!%p341_p9), 64  }
  0x16   : > { %v396_v0 = vld [vmem:[%s5904_s1 + $0x18] sm:$0x7]  ;;  %vm429_vm0 = vcmask 1042432   ;;  %v395_v1 = vld [vmem:[%s5904_s1 + $0x10] sm:$0xff]  ;;  %v394_v2 = vld [vmem:[%s5904_s1 + $0x8] sm:$0xff]  ;;  %s381_s16 = scalar_select %p380_p10, %s4236_s21, 1 }
  0x17   : > { %3717 = vmatprep.subr.msk.mxu0 %vm429_vm0, %v396_v0  ;;  %v393_v3 = vld [vmem:[%s5904_s1] sm:$0xff]  ;;  %vm404_vm1 = vcmask 220160   ;;  %v4296_v13 = vld [vmem:[%s5889_s3 + $0x8] sm:$0xff]   ;;  %vm550_vm2 = vcmask 523264   ;;  %v3458_v43 = vld [vmem:[%s5889_s3 + $0x10] sm:$0xff]   ;;  %vm1368_vm3 = vcmask 261120  }
  0x18   : > { %3718 = vmatpush3.msk.msra.mxu0 %vm429_vm0, %v396_v0  ;;  %s3419_s25 = sshll.u32 %s381_s16, 6  ;;  %v4291_v12 = vld [vmem:[%s5889_s3] sm:$0xff]   ;;  %v3427_v15 = vunpack.c.l.bf16 %v4296_v13  ;;  %v3428_v42 = vunpack.c.h.bf16 %v4296_v13  ;;  %v3459_v44 = vld [vmem:[%s5889_s3 + $0x18] sm:$0xff]   ;;  %v3431_v45 = vunpack.c.l.bf16 %v3458_v43  ;;  %v3432_v47 = vunpack.c.h.bf16 %v3458_v43  ;;  %v3461_v50 = vld [vmem:[%s5889_s3 + $0x28] sm:$0xff]   ;;  %s377_s16 = sand.u32 1, %s4138_s18  }
  0x19   : > { %3719 = vmatprep.subr.mxu0 %v395_v1  ;;  %s384_s12 = scalar_lea.vmem %s5905_s0, %s3419_s25  ;;  %v3423_v14 = vunpack.c.l.bf16 %v4291_v12  ;;  %v3348_v22 = vld [vmem:[%s5888_s2] ss:$0 sm:$0xff]  ;;  %v3424_v41 = vunpack.c.h.bf16 %v4291_v12  ;;  %v3435_v46 = vunpack.c.l.bf16 %v3459_v44  ;;  %v3436_v48 = vunpack.c.h.bf16 %v3459_v44  ;;  %v3462_v55 = vld [vmem:[%s5889_s3 + $0x30] sm:$0xff]   ;;  %v3463_v56 = vld [vmem:[%s5889_s3 + $0x38] sm:$0xff]   ;;  %s3345_s24 = sshll.u32 %s377_s16, 1 }
  0x1a   : > { %3720 = vmatpush3.msra.mxu0 %v395_v1  ;;  %v385_v4 = vld [vmem:[%s384_s12] sm:$0xff]  ;;  %v386_v5 = vld [vmem:[%s384_s12 + $0x8] sm:$0xff]  ;;  %v387_v6 = vld [vmem:[%s384_s12 + $0x10] sm:$0xff]  ;;  %v3443_v52 = vunpack.c.l.bf16 %v3461_v50  ;;  %v3444_v54 = vunpack.c.h.bf16 %v3461_v50  ;;  %v3447_v57 = vunpack.c.l.bf16 %v3462_v55  ;;  %v3451_v59 = vunpack.c.l.bf16 %v3463_v56  ;;  %s3268_s14 = scalar_lea.sflag [#allocation3], %s377_s16  ;;  %s4154_s0 = smov [#allocation2]  }
  0x1b   : > { %3721 = vmatprep.subr.mxu0 %v394_v2  ;;  %3725 = vmatprep.mubr.msk.f32.mxu0 %vm404_vm1, %v385_v4  ;;  %v388_v7 = vld [vmem:[%s384_s12 + $0x18] sm:$0xff]  ;;  %v389_v8 = vld [vmem:[%s384_s12 + $0x20] sm:$0xff]  ;;  %v390_v9 = vld [vmem:[%s384_s12 + $0x28] sm:$0xff]  ;;  %v3448_v60 = vunpack.c.h.bf16 %v3462_v55  ;;  %v3452_v61 = vunpack.c.h.bf16 %v3463_v56  ;;  %vm1373_vm4 = vcmask 785408   ;;  %vm4152_vm5 = vmmov 0   ;;  %s4090_s1 = sshll.u32 %s4154_s0, 4  ;;  %s4091_s1 = int_to_ptr.vmem [resolvable:$false] %s4090_s1 }
  0x1c   : > { %3722 = vmatpush3.msra.mxu0 %v394_v2  ;;  %v391_v10 = vld [vmem:[%s384_s12 + $0x30] sm:$0xff]  ;;  %v392_v11 = vld [vmem:[%s384_s12 + $0x38] sm:$0xff]  ;;  %3753 = vmatprep.mubr.msk.f32.mxu1 %vm550_vm2, %v3423_v14  ;;  %v3460_v49 = vld [vmem:[%s5889_s3 + $0x20] sm:$0xff]   ;;  %vm1585_vm6 = vcmask 130048  }
  0x1d   : > { %3723 = vmatprep.subr.mxu0 %v393_v3  ;;  %v3439_v51 = vunpack.c.l.bf16 %v3460_v49  ;;  %v3440_v53 = vunpack.c.h.bf16 %v3460_v49  ;;  %v3464_v58 = vld [vmem:[%s5889_s3 + $0x40] sm:$0xff]   ;;  %v1413_v0 = vld [vmem:[%s5890_s4 + $0xf8] sm:$0xff]  ;;  %v1412_v2 = vld [vmem:[%s5890_s4 + $0xf0] sm:$0xff] }
  0x1e   : > { %3724 = vmatpush3.msra.mxu0 %v393_v3  ;;  %v3455_v62 = vunpack.c.l.bf16 %v3464_v58  ;;  %v3456_v63 = vunpack.c.h.bf16 %v3464_v58  ;;  %v1397_v1 = vld [vmem:[%s5890_s4 + $0x78] sm:$0xff]  ;;  %v1396_v3 = vld [vmem:[%s5890_s4 + $0x70] sm:$0xff]  ;;  %v1411_v4 = vld [vmem:[%s5890_s4 + $0xe8] sm:$0xff] }
  0x1f   : > { %3726 = vmatmul.mubr.msk.f32.vlgmr.msra.gmra.mxu0 %vm404_vm1, %v386_v5  ;;  %v1395_v5 = vld [vmem:[%s5890_s4 + $0x68] sm:$0xff]  ;;  %v1392_v14 = vld [vmem:[%s5890_s4 + $0x50] sm:$0xff]  ;;  %v1382_v44 = vld [vmem:[%s5890_s4] sm:$0xff] }
  0x20   : > { %3728 = vmatprep.mubr.msk.f32.mxu0 %vm404_vm1, %v387_v6  ;;  %v1410_v6 = vld [vmem:[%s5890_s4 + $0xe0] sm:$0xff] }
  0x23   : > { %3729 = vmatmul.mubr.msk.f32.gmra.mxu0 %vm404_vm1, %v388_v7  ;;  %v1394_v7 = vld [vmem:[%s5890_s4 + $0x60] sm:$0xff] }
  0x24   : > { %3731 = vmatprep.mubr.msk.f32.mxu0 %vm404_vm1, %v389_v8  ;;  %v1409_v8 = vld [vmem:[%s5890_s4 + $0xd8] sm:$0xff] }
  0x27   : > { %3732 = vmatmul.mubr.msk.f32.gmra.mxu0 %vm404_vm1, %v390_v9 }
  0x28   : > { %3734 = vmatprep.mubr.msk.f32.mxu0 %vm404_vm1, %v391_v10  ;;  %v1393_v10 = vld [vmem:[%s5890_s4 + $0x58] sm:$0xff] }
  0x2b   : > { %3735 = vmatmul.mubr.msk.f32.gmra.mxu0 %vm404_vm1, %v392_v11  ;;  %v1408_v11 = vld [vmem:[%s5890_s4 + $0xd0] sm:$0xff] }
  0x2c   : > { %3772 = vmatprep.mubr.msk.f32.mxu0 %vm550_vm2, %v3427_v15  ;;  %v1407_v15 = vld [vmem:[%s5890_s4 + $0xc8] sm:$0xff] }
  0xdf   : > { %v3727_v16 = vpop.f32.mrf.mxu0 }
  0xe0   : > { %v505_v35 = vadd.f32 %v3727_v16, %v3348_v22  ;;  %v1391_v16 = vld [vmem:[%s5890_s4 + $0x48] sm:$0xff] }
  0xe1   : > { %v499_v17 = vpop.f32.mrf.mxu0 }
  0xe2   : > { %v500_v37 = vadd.f32 %v3348_v22, %v499_v17  ;;  %v4337_v39 = vmax.f32 %v505_v35, 0.0  ;;  %v1406_v17 = vld [vmem:[%s5890_s4 + $0xc0] sm:$0xff] }
  0xe3   : > { %v3730_v18 = vpop.f32.mrf.mxu0 }
  0xe4   : > { %v515_v31 = vadd.f32 %v3730_v18, %v3348_v22  ;;  %v4343_v40 = vmax.f32 %v500_v37, 0.0  ;;  %v1390_v18 = vld [vmem:[%s5890_s4 + $0x40] sm:$0xff]  ;;  %v1400_v37 = vld [vmem:[%s5890_s4 + $0x90] sm:$0xff] }
  0xe5   : > { %v509_v19 = vpop.f32.mrf.mxu0 }
  0xe6   : > { %v510_v33 = vadd.f32 %v3348_v22, %v509_v19  ;;  %v4325_v36 = vmax.f32 %v515_v31, 0.0  ;;  %v1405_v19 = vld [vmem:[%s5890_s4 + $0xb8] sm:$0xff]  ;;  %v1402_v31 = vld [vmem:[%s5890_s4 + $0xa0] sm:$0xff] }
  0xe7   : > { %v3733_v20 = vpop.f32.mrf.mxu0 }
  0xe8   : > { %v525_v26 = vadd.f32 %v3733_v20, %v3348_v22  ;;  %v4331_v38 = vmax.f32 %v510_v33, 0.0  ;;  %v1386_v33 = vld [vmem:[%s5890_s4 + $0x20] sm:$0xff] }
  0xe9   : > { %v519_v21 = vpop.f32.mrf.mxu0 }
  0xea   : > { %v520_v29 = vadd.f32 %v3348_v22, %v519_v21  ;;  %v4313_v32 = vmax.f32 %v525_v26, 0.0  ;;  %v1389_v21 = vld [vmem:[%s5890_s4 + $0x38] sm:$0xff] }
  0xeb   : > { %v3736_v23 = vpop.f32.mrf.mxu0 }
  0xec   : > { %v535_v24 = vadd.f32 %v3736_v23, %v3348_v22  ;;  %v4319_v34 = vmax.f32 %v520_v29, 0.0  ;;  %v1387_v29 = vld [vmem:[%s5890_s4 + $0x28] sm:$0xff] }
  0xed   : > { %v529_v25 = vpop.f32.mrf.mxu0 }
  0xee   : > { %v4305_v27 = vmax.f32 %v535_v24, 0.0  ;;  %v530_v28 = vadd.f32 %v3348_v22, %v529_v25  ;;  %v1404_v22 = vld [vmem:[%s5890_s4 + $0xb0] sm:$0xff] }
  0xef   : > { %v1388_v25 = vld [vmem:[%s5890_s4 + $0x30] sm:$0xff] }
  0xf0   : > { %v4307_v30 = vmax.f32 %v530_v28, 0.0  ;;  %3737 = vmatprep.subr.mxu1 %v4305_v27  ;;  %3756 = vmatprep.subr.mxu0 %v4305_v27 }
  0xf1   : > { %3738 = vmatpush3.msra.mxu1 %v4305_v27  ;;  %3757 = vmatpush3.msra.mxu0 %v4305_v27 }
  0xf2   : > { %3739 = vmatprep.subr.mxu1 %v4307_v30  ;;  %3758 = vmatprep.subr.mxu0 %v4307_v30 }
  0xf3   : > { %3740 = vmatpush3.msra.mxu1 %v4307_v30  ;;  %3759 = vmatpush3.msra.mxu0 %v4307_v30 }
  0xf4   : > { %3741 = vmatprep.subr.mxu1 %v4313_v32  ;;  %3760 = vmatprep.subr.mxu0 %v4313_v32 }
  0xf5   : > { %3742 = vmatpush3.msra.mxu1 %v4313_v32  ;;  %3761 = vmatpush3.msra.mxu0 %v4313_v32 }
  0xf6   : > { %3743 = vmatprep.subr.mxu1 %v4319_v34  ;;  %3762 = vmatprep.subr.mxu0 %v4319_v34 }
  0xf7   : > { %3744 = vmatpush3.msra.mxu1 %v4319_v34  ;;  %3763 = vmatpush3.msra.mxu0 %v4319_v34 }
  0xf8   : > { %3745 = vmatprep.subr.mxu1 %v4325_v36  ;;  %3764 = vmatprep.subr.mxu0 %v4325_v36 }
  0xf9   : > { %3746 = vmatpush3.msra.mxu1 %v4325_v36  ;;  %3765 = vmatpush3.msra.mxu0 %v4325_v36 }
  0xfa   : > { %3747 = vmatprep.subr.mxu1 %v4331_v38  ;;  %3766 = vmatprep.subr.mxu0 %v4331_v38 }
  0xfb   : > { %3748 = vmatpush3.msra.mxu1 %v4331_v38  ;;  %3767 = vmatpush3.msra.mxu0 %v4331_v38 }
  0xfc   : > { %3749 = vmatprep.subr.mxu1 %v4337_v39  ;;  %3768 = vmatprep.subr.mxu0 %v4337_v39 }
  0xfd   : > { %3750 = vmatpush3.msra.mxu1 %v4337_v39  ;;  %3769 = vmatpush3.msra.mxu0 %v4337_v39 }
  0xfe   : > { %3751 = vmatprep.subr.mxu1 %v4343_v40  ;;  %3770 = vmatprep.subr.mxu0 %v4343_v40 }
  0xff   : > { %3752 = vmatpush3.msra.mxu1 %v4343_v40  ;;  %3771 = vmatpush3.msra.mxu0 %v4343_v40 }
 0x100   : > { %3754 = vmatmul.mubr.msk.f32.vlgmr.msra.gmra.mxu1 %vm550_vm2, %v3424_v41  ;;  %3773 = vmatmul.mubr.msk.f32.vlgmr.msra.gmra.mxu0 %vm550_vm2, %v3428_v42  ;;  %v1383_v41 = vld [vmem:[%s5890_s4 + $0x8] sm:$0xff]  ;;  %v1398_v42 = vld [vmem:[%s5890_s4 + $0x80] sm:$0xff] }
 0x101   : > { %3775 = vmatprep.subr.mxu1 %v4305_v27  ;;  %3794 = vmatprep.subr.mxu0 %v4305_v27 }
 0x102   : > { %3776 = vmatpush3.msra.mxu1 %v4305_v27  ;;  %3795 = vmatpush3.msra.mxu0 %v4305_v27 }
 0x103   : > { %3777 = vmatprep.subr.mxu1 %v4307_v30  ;;  %3796 = vmatprep.subr.mxu0 %v4307_v30 }
 0x104   : > { %3778 = vmatpush3.msra.mxu1 %v4307_v30  ;;  %3797 = vmatpush3.msra.mxu0 %v4307_v30 }
 0x105   : > { %3779 = vmatprep.subr.mxu1 %v4313_v32  ;;  %3798 = vmatprep.subr.mxu0 %v4313_v32 }
 0x106   : > { %3780 = vmatpush3.msra.mxu1 %v4313_v32  ;;  %3799 = vmatpush3.msra.mxu0 %v4313_v32 }
 0x107   : > { %3781 = vmatprep.subr.mxu1 %v4319_v34  ;;  %3800 = vmatprep.subr.mxu0 %v4319_v34 }
 0x108   : > { %3782 = vmatpush3.msra.mxu1 %v4319_v34  ;;  %3801 = vmatpush3.msra.mxu0 %v4319_v34 }
 0x109   : > { %3783 = vmatprep.subr.mxu1 %v4325_v36  ;;  %3802 = vmatprep.subr.mxu0 %v4325_v36 }
 0x10a   : > { %3784 = vmatpush3.msra.mxu1 %v4325_v36  ;;  %3803 = vmatpush3.msra.mxu0 %v4325_v36 }
 0x10b   : > { %3785 = vmatprep.subr.mxu1 %v4331_v38  ;;  %3804 = vmatprep.subr.mxu0 %v4331_v38 }
 0x10c   : > { %3786 = vmatpush3.msra.mxu1 %v4331_v38  ;;  %3805 = vmatpush3.msra.mxu0 %v4331_v38 }
 0x10d   : > { %3787 = vmatprep.subr.mxu1 %v4337_v39  ;;  %3806 = vmatprep.subr.mxu0 %v4337_v39 }
 0x10e   : > { %3788 = vmatpush3.msra.mxu1 %v4337_v39  ;;  %3807 = vmatpush3.msra.mxu0 %v4337_v39 }
 0x10f   : > { %3789 = vmatprep.subr.mxu1 %v4343_v40  ;;  %3808 = vmatprep.subr.mxu0 %v4343_v40 }
 0x110   : > { %3790 = vmatpush3.msra.mxu1 %v4343_v40  ;;  %3791 = vmatprep.mubr.msk.f32.mxu1 %vm550_vm2, %v3431_v45  ;;  %v1417_v45 = vld [vmem:[%s5890_s4 + $0x118] sm:$0xff] }
 0x111   : > { %3809 = vmatpush3.msra.mxu0 %v4343_v40  ;;  %3810 = vmatprep.mubr.msk.f32.mxu0 %vm550_vm2, %v3435_v46 }
 0x112   : > { %3792 = vmatmul.mubr.msk.f32.vlgmr.msra.gmra.mxu1 %vm550_vm2, %v3432_v47  ;;  %3811 = vmatmul.mubr.msk.f32.vlgmr.msra.gmra.mxu0 %vm550_vm2, %v3436_v48 }
 0x113   : > { %3813 = vmatprep.subr.mxu1 %v4305_v27  ;;  %3832 = vmatprep.subr.mxu0 %v4305_v27 }
 0x114   : > { %3814 = vmatpush3.msra.mxu1 %v4305_v27  ;;  %3833 = vmatpush3.msra.mxu0 %v4305_v27 }
 0x115   : > { %3815 = vmatprep.subr.mxu1 %v4307_v30  ;;  %3834 = vmatprep.subr.mxu0 %v4307_v30 }
 0x116   : > { %3816 = vmatpush3.msra.mxu1 %v4307_v30  ;;  %3835 = vmatpush3.msra.mxu0 %v4307_v30 }
 0x117   : > { %3817 = vmatprep.subr.mxu1 %v4313_v32  ;;  %3836 = vmatprep.subr.mxu0 %v4313_v32 }
 0x118   : > { %3818 = vmatpush3.msra.mxu1 %v4313_v32  ;;  %3837 = vmatpush3.msra.mxu0 %v4313_v32 }
 0x119   : > { %3819 = vmatprep.subr.mxu1 %v4319_v34  ;;  %3838 = vmatprep.subr.mxu0 %v4319_v34 }
 0x11a   : > { %3820 = vmatpush3.msra.mxu1 %v4319_v34  ;;  %3839 = vmatpush3.msra.mxu0 %v4319_v34 }
 0x11b   : > { %3821 = vmatprep.subr.mxu1 %v4325_v36  ;;  %3840 = vmatprep.subr.mxu0 %v4325_v36 }
 0x11c   : > { %3822 = vmatpush3.msra.mxu1 %v4325_v36  ;;  %3841 = vmatpush3.msra.mxu0 %v4325_v36 }
 0x11d   : > { %3823 = vmatprep.subr.mxu1 %v4331_v38  ;;  %3842 = vmatprep.subr.mxu0 %v4331_v38 }
 0x11e   : > { %3824 = vmatpush3.msra.mxu1 %v4331_v38  ;;  %3843 = vmatpush3.msra.mxu0 %v4331_v38 }
 0x11f   : > { %3825 = vmatprep.subr.mxu1 %v4337_v39  ;;  %3844 = vmatprep.subr.mxu0 %v4337_v39 }
 0x120   : > { %3826 = vmatpush3.msra.mxu1 %v4337_v39  ;;  %3845 = vmatpush3.msra.mxu0 %v4337_v39 }
 0x121   : > { %3827 = vmatprep.subr.mxu1 %v4343_v40  ;;  %3846 = vmatprep.subr.mxu0 %v4343_v40 }
 0x122   : > { %3828 = vmatpush3.msra.mxu1 %v4343_v40  ;;  %3829 = vmatprep.mubr.msk.f32.mxu1 %vm550_vm2, %v3439_v51 }
 0x123   : > { %3847 = vmatpush3.msra.mxu0 %v4343_v40  ;;  %3848 = vmatprep.mubr.msk.f32.mxu0 %vm550_vm2, %v3443_v52 }
 0x124   : > { %3830 = vmatmul.mubr.msk.f32.vlgmr.msra.gmra.mxu1 %vm550_vm2, %v3440_v53  ;;  %3849 = vmatmul.mubr.msk.f32.vlgmr.msra.gmra.mxu0 %vm550_vm2, %v3444_v54 }
 0x125   : > { %3851 = vmatprep.subr.mxu1 %v4305_v27  ;;  %3870 = vmatprep.subr.mxu0 %v4305_v27 }
 0x126   : > { %3852 = vmatpush3.msra.mxu1 %v4305_v27  ;;  %3871 = vmatpush3.msra.mxu0 %v4305_v27 }
 0x127   : > { %3853 = vmatprep.subr.mxu1 %v4307_v30  ;;  %3872 = vmatprep.subr.mxu0 %v4307_v30 }
 0x128   : > { %3854 = vmatpush3.msra.mxu1 %v4307_v30  ;;  %3873 = vmatpush3.msra.mxu0 %v4307_v30 }
 0x129   : > { %3855 = vmatprep.subr.mxu1 %v4313_v32  ;;  %3874 = vmatprep.subr.mxu0 %v4313_v32 }
 0x12a   : > { %3856 = vmatpush3.msra.mxu1 %v4313_v32  ;;  %3875 = vmatpush3.msra.mxu0 %v4313_v32 }
 0x12b   : > { %3857 = vmatprep.subr.mxu1 %v4319_v34  ;;  %3876 = vmatprep.subr.mxu0 %v4319_v34 }
 0x12c   : > { %3858 = vmatpush3.msra.mxu1 %v4319_v34  ;;  %3877 = vmatpush3.msra.mxu0 %v4319_v34 }
 0x12d   : > { %3859 = vmatprep.subr.mxu1 %v4325_v36  ;;  %3878 = vmatprep.subr.mxu0 %v4325_v36 }
 0x12e   : > { %3860 = vmatpush3.msra.mxu1 %v4325_v36  ;;  %3879 = vmatpush3.msra.mxu0 %v4325_v36 }
 0x12f   : > { %3861 = vmatprep.subr.mxu1 %v4331_v38  ;;  %3880 = vmatprep.subr.mxu0 %v4331_v38 }
 0x130   : > { %3862 = vmatpush3.msra.mxu1 %v4331_v38  ;;  %3881 = vmatpush3.msra.mxu0 %v4331_v38 }
 0x131   : > { %3863 = vmatprep.subr.mxu1 %v4337_v39  ;;  %3882 = vmatprep.subr.mxu0 %v4337_v39 }
 0x132   : > { %3864 = vmatpush3.msra.mxu1 %v4337_v39  ;;  %3883 = vmatpush3.msra.mxu0 %v4337_v39 }
 0x133   : > { %3865 = vmatprep.subr.mxu1 %v4343_v40  ;;  %3884 = vmatprep.subr.mxu0 %v4343_v40 }
 0x134   : > { %3866 = vmatpush3.msra.mxu1 %v4343_v40  ;;  %3867 = vmatprep.mubr.msk.f32.mxu1 %vm550_vm2, %v3447_v57 }
 0x135   : > { %3885 = vmatpush3.msra.mxu0 %v4343_v40  ;;  %3886 = vmatprep.mubr.msk.f32.mxu0 %vm550_vm2, %v3451_v59 }
 0x136   : > { %3868 = vmatmul.mubr.msk.f32.vlgmr.msra.gmra.mxu1 %vm550_vm2, %v3448_v60  ;;  %3887 = vmatmul.mubr.msk.f32.vlgmr.msra.gmra.mxu0 %vm550_vm2, %v3452_v61 }
 0x137   : > { %3889 = vmatprep.subr.mxu1 %v4305_v27  ;;  %3905 = vmatprep.mubr.msk.f32.mxu1 %vm550_vm2, %v3455_v62 }
 0x138   : > { %3890 = vmatpush3.msra.mxu1 %v4305_v27  ;;  %3567 = vmatprep.subr.mxu0 %v1413_v0  ;;  %v1403_v27 = vld [vmem:[%s5890_s4 + $0xa8] sm:$0xff] }
 0x139   : > { %3891 = vmatprep.subr.mxu1 %v4307_v30  ;;  %3568 = vmatpush3.msra.mxu0 %v1397_v1 }
 0x13a   : > { %3892 = vmatpush3.msra.mxu1 %v4307_v30  ;;  %3569 = vmatprep.subr.mxu0 %v1412_v2 }
 0x13b   : > { %3893 = vmatprep.subr.mxu1 %v4313_v32  ;;  %3570 = vmatpush3.msra.mxu0 %v1396_v3 }
 0x13c   : > { %3894 = vmatpush3.msra.mxu1 %v4313_v32  ;;  %3571 = vmatprep.subr.mxu0 %v1411_v4 }
 0x13d   : > { %3895 = vmatprep.subr.mxu1 %v4319_v34  ;;  %3572 = vmatpush3.msra.mxu0 %v1395_v5 }
 0x13e   : > { %3896 = vmatpush3.msra.mxu1 %v4319_v34  ;;  %3573 = vmatprep.subr.mxu0 %v1410_v6  ;;  %v1401_v34 = vld [vmem:[%s5890_s4 + $0x98] sm:$0xff] }
 0x13f   : > { %3897 = vmatprep.subr.mxu1 %v4325_v36  ;;  %3574 = vmatpush3.msra.mxu0 %v1394_v7 }
 0x140   : > { %3898 = vmatpush3.msra.mxu1 %v4325_v36  ;;  %3575 = vmatprep.subr.mxu0 %v1409_v8  ;;  %v1385_v36 = vld [vmem:[%s5890_s4 + $0x18] sm:$0xff] }
 0x141   : > { %3899 = vmatprep.subr.mxu1 %v4331_v38  ;;  %3576 = vmatpush3.msra.mxu0 %v1393_v10 }
 0x142   : > { %3900 = vmatpush3.msra.mxu1 %v4331_v38  ;;  %3577 = vmatprep.subr.mxu0 %v1408_v11 }
 0x143   : > { %3901 = vmatprep.subr.mxu1 %v4337_v39  ;;  %3578 = vmatpush3.msra.mxu0 %v1392_v14 }
 0x144   : > { %3902 = vmatpush3.msra.mxu1 %v4337_v39  ;;  %3579 = vmatprep.subr.mxu0 %v1407_v15  ;;  %v1384_v39 = vld [vmem:[%s5890_s4 + $0x10] sm:$0xff] }
 0x145   : > { %3903 = vmatprep.subr.mxu1 %v4343_v40  ;;  %3580 = vmatpush3.msra.mxu0 %v1391_v16  ;;  %v1416_v16 = vld [vmem:[%s5890_s4 + $0x110] sm:$0xff] }
 0x146   : > { %3904 = vmatpush3.msra.mxu1 %v4343_v40  ;;  %3581 = vmatprep.subr.mxu0 %v1406_v17  ;;  %v1399_v40 = vld [vmem:[%s5890_s4 + $0x88] sm:$0xff] }
 0x147   : > { %3906 = vmatmul.mubr.msk.f32.vlgmr.msra.gmra.mxu1 %vm550_vm2, %v3456_v63  ;;  %3582 = vmatpush3.msra.mxu0 %v1390_v18 }
 0x148   : > { %3583 = vmatprep.subr.mxu0 %v1405_v19 }
 0x149   : > { %3584 = vmatpush3.msra.mxu0 %v1389_v21  ;;  %v1415_v21 = vld [vmem:[%s5890_s4 + $0x108] sm:$0xff] }
 0x14a   : > { %3585 = vmatprep.subr.mxu0 %v1404_v22 }
 0x14b   : > { %3586 = vmatpush3.msra.mxu0 %v1388_v25 }
 0x14c   : > { %3587 = vmatprep.subr.mxu0 %v1403_v27 }
 0x14d   : > { %3588 = vmatpush3.msra.mxu0 %v1387_v29 }
 0x14e   : > { %3589 = vmatprep.subr.mxu0 %v1402_v31 }
 0x14f   : > { %3590 = vmatpush3.msra.mxu0 %v1386_v33 }
 0x150   : > { %3591 = vmatprep.subr.mxu0 %v1401_v34 }
 0x151   : > { %3592 = vmatpush3.msra.mxu0 %v1385_v36 }
 0x152   : > { %3593 = vmatprep.subr.mxu0 %v1400_v37 }
 0x153   : > { %3594 = vmatpush3.msra.mxu0 %v1384_v39 }
 0x154   : > { %3595 = vmatprep.subr.mxu0 %v1399_v40  ;;  %v1583_v40 = vld [vmem:[%s5892_s6] sm:$0x3] }
 0x155   : > { %3596 = vmatpush3.msra.mxu0 %v1383_v41 }
 0x156   : > { %3597 = vmatprep.subr.mxu0 %v1398_v42  ;;  %v3404_v42 = vld [vmem:[%s5892_s6 + $0xa] sm:$0x3] }
 0x157   : > { %3598 = vmatpush3.msra.mxu0 %v1382_v44 }
 0x158   : > { %3908 = vmatprep.subr.mxu0 %v1417_v45 }
 0x1c0   : > { %v3774_v9 = vpop.f32.mrf.mxu0  ;;  %v4563_v23 = vpop.f32.mrf.mxu1 }
 0x1c2   : > { %v709_v12 = vpop.f32.mrf.mxu0  ;;  %v623_v32 = vpop.f32.mrf.mxu1 }
 0x1d2   : > { %v4537_v13 = vpop.f32.mrf.mxu0  ;;  %v3793_v35 = vpop.f32.mrf.mxu1 }
 0x1d4   : > { %v881_v20 = vpop.f32.mrf.mxu0  ;;  %v795_v38 = vpop.f32.mrf.mxu1 }
 0x1e4   : > { %v3850_v24 = vpop.f32.mrf.mxu0  ;;  %v3831_v43 = vpop.f32.mrf.mxu1 }
 0x1e5   : > { %v4046_v26 = vpack.i.bf16 %v3774_v9, %v3850_v24 }
 0x1e6   : > { %v1053_v28 = vpop.f32.mrf.mxu0  ;;  %v967_v46 = vpop.f32.mrf.mxu1 }
 0x1e7   : > { %v4051_v30 = vpack.i.bf16 %v709_v12, %v1053_v28  ;;  %4047 = vrot.lane.b32.xlu1 %v4046_v26, %s4148_s22  ;;  %v4151_v26 = vmov 0.0  }
 0x1e8   : > { %3919 = vmatprep.subr.mxu1 %v4151_v26  ;;  %3923 = vmatprep.mubr.msk.f32.mxu1 %vm4152_vm5, %v4151_v26 }
 0x1e9   : > { %4052 = vrot.lane.b32.xlu0 %v4051_v30, %s4148_s22  ;;  %s3420_s22 = sshll.u32 %s4236_s21, 5  ;;  %s4092_s21 = scalar_lea.vmem %s4091_s1, 64 }
 0x1ea   : > { %s3280_s13 = scalar_lea.hbm %s5897_s11, %s3420_s22 }
 0x1f6   : > { %v3869_v47 = vpop.f32.mrf.mxu1  ;;  %v3888_v48 = vpop.f32.mrf.mxu0 }
 0x1f7   : > { %v4061_v53 = vpack.i.bf16 %v3793_v35, %v3869_v47  ;;  %v4071_v54 = vpack.i.bf16 %v4537_v13, %v3888_v48  ;;  %v3408_v48 = vld [vmem:[%s5892_s6 + $0xe] sm:$0x3] }
 0x1f8   : > { %v1139_v49 = vpop.f32.mrf.mxu1  ;;  %v1225_v50 = vpop.f32.mrf.mxu0 }
 0x1f9   : > { %v4056_v51 = vpack.i.bf16 %v795_v38, %v1139_v49  ;;  %v4066_v52 = vpack.i.bf16 %v881_v20, %v1225_v50  ;;  %v3398_v49 = vld [vmem:[%s5892_s6 + $0x4] sm:$0x3]  ;;  %v2117_v50 = vunpack.c.l.bf16 %v3408_v48  ;;  %v2305_v48 = vld [vmem:[%s5893_s7 + $0x90] sm:$0xff] }
 0x1fb   : > { %4067 = vrot.lane.b32.xlu1 %v4066_v52, %s4149_s29  ;;  %4057 = vrot.lane.b32.xlu0 %v4056_v51, %s5898_s30  ;;  %v1737_v51 = vunpack.c.l.bf16 %v3398_v49  ;;  %v3400_v52 = vld [vmem:[%s5892_s6 + $0x6] sm:$0x3]  ;;  %v2322_v49 = vld [vmem:[%s5893_s7 + $0x118] sm:$0xff] }
 0x1ff   : > { %4072 = vrot.lane.b32.xlu1 %v4071_v54, %s4149_s29  ;;  %4062 = vrot.lane.b32.xlu0 %v4061_v53, %s5898_s30  ;;  %v1813_v53 = vunpack.c.l.bf16 %v3400_v52  ;;  %v3402_v54 = vld [vmem:[%s5892_s6 + $0x8] sm:$0x3]  ;;  %s5906_s30 = smov 64  }
 0x207   : > { %v3907_v7 = vpop.f32.mrf.mxu1 }
 0x209   : > { %v1311_v25 = vpop.f32.mrf.mxu1 }
 0x259   : > { %v4048_v56 = vpop.permute.xlu1 %4047 }
 0x25a   : > { %v4050_v1 = vunpack.i.h.bf16 %v4048_v56  ;;  %v4049_v2 = vunpack.i.l.bf16 %v4048_v56  ;;  %v3406_v56 = vld [vmem:[%s5892_s6 + $0xc] sm:$0x3] }
 0x25b   : > { %v4053_v55 = vpop.permute.xlu0 %4052 }
 0x25c   : > { %v4055_v57 = vunpack.i.h.bf16 %v4053_v55  ;;  %v4054_v58 = vunpack.i.l.bf16 %v4053_v55  ;;  %v1377_v17 = vsel %vm1368_vm3, %v3831_v43, %v4049_v2  ;;  %v1370_v18 = vsel %vm1368_vm3, %v4563_v23, %v4050_v1  ;;  %v1414_v23 = vld [vmem:[%s5890_s4 + $0x100] sm:$0xff]  ;;  %v2316_v1 = vld [vmem:[%s5893_s7 + $0xe8] sm:$0xff]  ;;  %v2334_v2 = vld [vmem:[%s5893_s7 + $0x178] sm:$0xff] }
 0x25d   : > { %v1584_v43 = vunpack.c.l.bf16 %v1583_v40  ;;  %v1889_v55 = vunpack.c.l.bf16 %v3402_v54  ;;  %v2307_v40 = vld [vmem:[%s5893_s7 + $0xa0] sm:$0xff] }
 0x25e   : > { %v1369_v3 = vsel %vm1368_vm3, %v623_v32, %v4055_v57  ;;  %v1376_v4 = vsel %vm1368_vm3, %v967_v46, %v4054_v58  ;;  %v3392_v32 = vld [vmem:[%s5891_s5] ss:$0 sm:$0xff]  ;;  %v3396_v46 = vld [vmem:[%s5892_s6 + $0x2] sm:$0x3]  ;;  %v2041_v57 = vunpack.c.l.bf16 %v3406_v56  ;;  %v3410_v58 = vld [vmem:[%s5892_s6 + $0x10] sm:$0x3] }
 0x25f   : > { %v1661_v47 = vunpack.c.l.bf16 %v3396_v46  ;;  %v2290_v46 = vld [vmem:[%s5893_s7 + $0x18] sm:$0xff]  ;;  %v2337_v56 = vld [vmem:[%s5893_s7 + $0x190] sm:$0xff] }
 0x26d   : > { %v4068_v59 = vpop.permute.xlu1 %4067  ;;  %v4058_v60 = vpop.permute.xlu0 %4057 }
 0x26e   : > { %v4070_v61 = vunpack.i.h.bf16 %v4068_v59  ;;  %v4069_v62 = vunpack.i.l.bf16 %v4068_v59  ;;  %v4060_v63 = vunpack.i.h.bf16 %v4058_v60  ;;  %v4059_v0 = vunpack.i.l.bf16 %v4058_v60  ;;  %v2318_v60 = vld [vmem:[%s5893_s7 + $0xf8] sm:$0xff] }
 0x26f   : > { %v2193_v59 = vunpack.c.l.bf16 %v3410_v58  ;;  %v2303_v58 = vld [vmem:[%s5893_s7 + $0x80] sm:$0xff] }
 0x270   : > { %v1378_v5 = vsel %vm550_vm2, %v1376_v4, %v4059_v0  ;;  %v1371_v6 = vsel %vm550_vm2, %v1369_v3, %v4060_v63  ;;  %v2301_v63 = vld [vmem:[%s5893_s7 + $0x70] sm:$0xff]  ;;  %v2350_v0 = vld [vmem:[%s5893_s7 + $0x1f8] sm:$0xff]  ;;  %v2300_v4 = vld [vmem:[%s5893_s7 + $0x68] sm:$0xff] }
 0x271   : > { %v4073_v8 = vpop.permute.xlu1 %4072  ;;  %v4063_v9 = vpop.permute.xlu0 %4062  ;;  %v1380_v10 = vsel %vm1373_vm4, %v1378_v5, %v4069_v62  ;;  %v1374_v11 = vsel %vm1373_vm4, %v1371_v6, %v4070_v61  ;;  %v2302_v61 = vld [vmem:[%s5893_s7 + $0x78] sm:$0xff]  ;;  %v2317_v62 = vld [vmem:[%s5893_s7 + $0xf0] sm:$0xff]  ;;  %v2315_v6 = vld [vmem:[%s5893_s7 + $0xe0] sm:$0xff] }
 0x272   : > { %v4075_v12 = vunpack.i.h.bf16 %v4073_v8  ;;  %v4074_v13 = vunpack.i.l.bf16 %v4073_v8  ;;  %v4065_v14 = vunpack.i.h.bf16 %v4063_v9  ;;  %v4064_v15 = vunpack.i.l.bf16 %v4063_v9  ;;  %1495 = vmatprep.mubr.f32.mxu0 %v1380_v10  ;;  %v2349_v3 = vld [vmem:[%s5893_s7 + $0x1f0] sm:$0xff]  ;;  %v2332_v8 = vld [vmem:[%s5893_s7 + $0x168] sm:$0xff]  ;;  %v2299_v9 = vld [vmem:[%s5893_s7 + $0x60] sm:$0xff] }
 0x273   : > { %1496 = vmatmul.mubr.f32.vlgmr.msra.gmra.mxu0 %v1374_v11  ;;  %v2333_v5 = vld [vmem:[%s5893_s7 + $0x170] sm:$0xff]  ;;  %v2347_v10 = vld [vmem:[%s5893_s7 + $0x1e0] sm:$0xff]  ;;  %v2314_v11 = vld [vmem:[%s5893_s7 + $0xd8] sm:$0xff] }
 0x274   : > { %3909 = vmatpush3.msra.mxu0 %v1417_v45  ;;  %v1379_v19 = vsel %vm550_vm2, %v1377_v17, %v4064_v15  ;;  %v1372_v20 = vsel %vm550_vm2, %v1370_v18, %v4065_v14  ;;  %v1965_v45 = vunpack.c.l.bf16 %v3404_v42  ;;  %v2346_v14 = vld [vmem:[%s5893_s7 + $0x1d8] sm:$0xff]  ;;  %v2313_v15 = vld [vmem:[%s5893_s7 + $0xd0] sm:$0xff]  ;;  %v2291_v42 = vld [vmem:[%s5893_s7 + $0x20] sm:$0xff] }
 0x275   : > { %3910 = vmatprep.subr.mxu0 %v1416_v16  ;;  %v1381_v22 = vsel %vm1373_vm4, %v1379_v19, %v4074_v13  ;;  %v1375_v24 = vsel %vm1373_vm4, %v1372_v20, %v4075_v12  ;;  %v2331_v12 = vld [vmem:[%s5893_s7 + $0x160] sm:$0xff]  ;;  %v2298_v13 = vld [vmem:[%s5893_s7 + $0x58] sm:$0xff]  ;;  %v2297_v17 = vld [vmem:[%s5893_s7 + $0x50] sm:$0xff] }
 0x276   : > { %1500 = vmatprep.mubr.f32.mxu0 %v1381_v22  ;;  %3911 = vmatpush3.msra.mxu0 %v1416_v16  ;;  %v2330_v16 = vld [vmem:[%s5893_s7 + $0x158] sm:$0xff]  ;;  %v2345_v18 = vld [vmem:[%s5893_s7 + $0x1d0] sm:$0xff]  ;;  %v2312_v19 = vld [vmem:[%s5893_s7 + $0xc8] sm:$0xff] }
 0x277   : > { %1501 = vmatmul.mubr.f32.gmra.mxu0 %v1375_v24  ;;  %3912 = vmatprep.subr.mxu0 %v1415_v21  ;;  %v2329_v20 = vld [vmem:[%s5893_s7 + $0x150] sm:$0xff]  ;;  %v2344_v22 = vld [vmem:[%s5893_s7 + $0x1c8] sm:$0xff]  ;;  %v2311_v24 = vld [vmem:[%s5893_s7 + $0xc0] sm:$0xff] }
 0x278   : > { %3913 = vmatpush3.msra.mxu0 %v1415_v21  ;;  %3916 = vmatprep.mubr.msk.f32.mxu0 %vm1368_vm3, %v1311_v25  ;;  %v2296_v21 = vld [vmem:[%s5893_s7 + $0x48] sm:$0xff] }
 0x279   : > { %3914 = vmatprep.subr.mxu0 %v1414_v23  ;;  %v2328_v25 = vld [vmem:[%s5893_s7 + $0x148] sm:$0xff] }
 0x27a   : > { %3915 = vmatpush3.msra.mxu0 %v1414_v23  ;;  %v2295_v23 = vld [vmem:[%s5893_s7 + $0x40] sm:$0xff] }
 0x27b   : > { %3917 = vmatmul.mubr.msk.f32.vlgmr.msra.gmra.mxu0 %vm1368_vm3, %v3907_v7  ;;  %3954 = vmatprep.subr.mxu0 %v4151_v26  ;;  %v2348_v7 = vld [vmem:[%s5893_s7 + $0x1e8] sm:$0xff] }
 0x27c   : > { %3958 = vmatprep.mubr.msk.f32.mxu0 %vm4152_vm5, %v4151_v26 }
 0x333   : > { %v3599_v27 = vpop.f32.mrf.mxu0 }
 0x335   : > { %v3600_v28 = vpop.f32.mrf.mxu0 }
 0x336   : > { %v3601_v30 = vadd.f32 %v3600_v28, %v3599_v27  ;;  %v2343_v27 = vld [vmem:[%s5893_s7 + $0x1c0] sm:$0xff]  ;;  %v2310_v28 = vld [vmem:[%s5893_s7 + $0xb8] sm:$0xff] }
 0x337   : > { %v3602_v29 = vpop.f32.mrf.mxu0 }
 0x338   : > { %v1498_v36 = vadd.f32 %v3601_v30, %v3392_v32  ;;  %v2294_v30 = vld [vmem:[%s5893_s7 + $0x38] sm:$0xff] }
 0x339   : > { %v3603_v31 = vpop.f32.mrf.mxu0 }
 0x33a   : > { %v3604_v33 = vadd.f32 %v3603_v31, %v3602_v29  ;;  %v2327_v29 = vld [vmem:[%s5893_s7 + $0x140] sm:$0xff]  ;;  %v2342_v31 = vld [vmem:[%s5893_s7 + $0x1b8] sm:$0xff] }
 0x33b   : > { %v3918_v34 = vpop.f32.mrf.mxu0 }
 0x33c   : > { %v1503_v35 = vadd.f32 %v3604_v33, %v3392_v32  ;;  %v2309_v32 = vld [vmem:[%s5893_s7 + $0xb0] sm:$0xff]  ;;  %v2326_v33 = vld [vmem:[%s5893_s7 + $0x138] sm:$0xff] }
 0x33d   : > { %v1572_v37 = vpop.f32.mrf.mxu0 }
 0x33e   : > { %v1578_v38 = vadd.f32 %v3918_v34, %v1503_v35  ;;  %v1573_v39 = vadd.f32 %v1572_v37, %v1498_v36  ;;  %v2293_v34 = vld [vmem:[%s5893_s7 + $0x30] sm:$0xff]  ;;  %v2308_v36 = vld [vmem:[%s5893_s7 + $0xa8] sm:$0xff] }
 0x33f   : > { %v2341_v35 = vld [vmem:[%s5893_s7 + $0x1b0] sm:$0xff] }
 0x340   : > { %v4646_v41 = vmax.f32 %v1578_v38, 0.0  ;;  %v4651_v44 = vmax.f32 %v1573_v39, 0.0  ;;  %v2325_v37 = vld [vmem:[%s5893_s7 + $0x130] sm:$0xff]  ;;  %v2292_v38 = vld [vmem:[%s5893_s7 + $0x28] sm:$0xff] }
 0x341   : > { %v2340_v39 = vld [vmem:[%s5893_s7 + $0x1a8] sm:$0xff] }
 0x342   : > { %3920 = vmatpush3.msra.mxu1 %v4646_v41  ;;  %3955 = vmatpush3.msra.mxu0 %v4646_v41 }
 0x343   : > { %3921 = vmatprep.subr.mxu1 %v4151_v26  ;;  %3956 = vmatprep.subr.mxu0 %v4151_v26 }
 0x344   : > { %3922 = vmatpush3.msra.mxu1 %v4651_v44  ;;  %3957 = vmatpush3.msra.mxu0 %v4651_v44 }
 0x345   : > { %3924 = vmatmul.mubr.msk.f32.vlgmr.msra.gmra.mxu1 %vm1585_vm6, %v1584_v43  ;;  %3926 = vmatprep.subr.mxu1 %v4151_v26  ;;  %v2339_v43 = vld [vmem:[%s5893_s7 + $0x1a0] sm:$0xff] }
 0x346   : > { %3968 = vmatprep.subr.mxu0 %v4151_v26  ;;  %3927 = vmatpush3.msra.mxu1 %v4646_v41 }
 0x347   : > { %3959 = vmatmul.mubr.msk.f32.vlgmr.msra.gmra.mxu0 %vm1585_vm6, %v1965_v45  ;;  %3928 = vmatprep.subr.mxu1 %v4151_v26  ;;  %v2323_v45 = vld [vmem:[%s5893_s7 + $0x120] sm:$0xff] }
 0x348   : > { %3969 = vmatpush3.msra.mxu0 %v4646_v41  ;;  %3929 = vmatpush3.msra.mxu1 %v4651_v44 }
 0x349   : > { %3970 = vmatprep.subr.mxu0 %v4151_v26  ;;  %3930 = vmatprep.mubr.msk.f32.mxu1 %vm4152_vm5, %v4151_v26 }
 0x34a   : > { %3971 = vmatpush3.msra.mxu0 %v4651_v44  ;;  %3931 = vmatmul.mubr.msk.f32.vlgmr.msra.gmra.mxu1 %vm1585_vm6, %v1661_v47  ;;  %v2338_v47 = vld [vmem:[%s5893_s7 + $0x198] sm:$0xff] }
 0x34b   : > { %3933 = vmatprep.subr.mxu1 %v4151_v26  ;;  %3937 = vmatprep.mubr.msk.f32.mxu1 %vm4152_vm5, %v4151_v26 }
 0x34c   : > { %3934 = vmatpush3.msra.mxu1 %v4646_v41  ;;  %3972 = vmatprep.mubr.msk.f32.mxu0 %vm4152_vm5, %v4151_v26 }
 0x34d   : > { %3935 = vmatprep.subr.mxu1 %v4151_v26  ;;  %3973 = vmatmul.mubr.msk.f32.vlgmr.msra.gmra.mxu0 %vm1585_vm6, %v2117_v50  ;;  %v2289_v50 = vld [vmem:[%s5893_s7 + $0x10] sm:$0xff] }
 0x34e   : > { %3936 = vmatpush3.msra.mxu1 %v4651_v44  ;;  %3638 = vmatprep.subr.mxu0 %v2318_v60  ;;  %v2287_v60 = vld [vmem:[%s5893_s7] sm:$0xff] }
 0x34f   : > { %3938 = vmatmul.mubr.msk.f32.vlgmr.msra.gmra.mxu1 %vm1585_vm6, %v1737_v51  ;;  %3940 = vmatprep.subr.mxu1 %v4151_v26  ;;  %v2304_v51 = vld [vmem:[%s5893_s7 + $0x88] sm:$0xff] }
 0x350   : > { %3941 = vmatpush3.msra.mxu1 %v4646_v41  ;;  %3944 = vmatprep.mubr.msk.f32.mxu1 %vm4152_vm5, %v4151_v26 }
 0x351   : > { %3942 = vmatprep.subr.mxu1 %v4151_v26  ;;  %3639 = vmatpush3.msra.mxu0 %v2302_v61 }
 0x352   : > { %3943 = vmatpush3.msra.mxu1 %v4651_v44  ;;  %3640 = vmatprep.subr.mxu0 %v2317_v62  ;;  %v2336_v62 = vld [vmem:[%s5893_s7 + $0x188] sm:$0xff] }
 0x353   : > { %3945 = vmatmul.mubr.msk.f32.vlgmr.msra.gmra.mxu1 %vm1585_vm6, %v1813_v53  ;;  %3947 = vmatprep.subr.mxu1 %v4151_v26 }
 0x354   : > { %3948 = vmatpush3.msra.mxu1 %v4646_v41  ;;  %3951 = vmatprep.mubr.msk.f32.mxu1 %vm4152_vm5, %v4151_v26 }
 0x355   : > { %3949 = vmatprep.subr.mxu1 %v4151_v26  ;;  %3641 = vmatpush3.msra.mxu0 %v2301_v63  ;;  %v2320_v63 = vld [vmem:[%s5893_s7 + $0x108] sm:$0xff] }
 0x356   : > { %3950 = vmatpush3.msra.mxu1 %v4651_v44  ;;  %3642 = vmatprep.subr.mxu0 %v2316_v1  ;;  %v2335_v1 = vld [vmem:[%s5893_s7 + $0x180] sm:$0xff] }
 0x357   : > { %3961 = vmatprep.subr.mxu1 %v4151_v26  ;;  %3952 = vmatmul.mubr.msk.f32.vlgmr.msra.gmra.mxu1 %vm1585_vm6, %v1889_v55  ;;  %v2288_v55 = vld [vmem:[%s5893_s7 + $0x8] sm:$0xff] }
 0x358   : > { %3962 = vmatpush3.msra.mxu1 %v4646_v41  ;;  %3965 = vmatprep.mubr.msk.f32.mxu1 %vm4152_vm5, %v4151_v26 }
 0x359   : > { %3963 = vmatprep.subr.mxu1 %v4151_v26  ;;  %3643 = vmatpush3.msra.mxu0 %v2300_v4  ;;  %v2319_v4 = vld [vmem:[%s5893_s7 + $0x100] sm:$0xff] }
 0x35a   : > { %3964 = vmatpush3.msra.mxu1 %v4651_v44  ;;  %3644 = vmatprep.subr.mxu0 %v2315_v6 }
 0x35b   : > { %3975 = vmatprep.subr.mxu1 %v4151_v26  ;;  %3966 = vmatmul.mubr.msk.f32.vlgmr.msra.gmra.mxu1 %vm1585_vm6, %v2041_v57 }
 0x35c   : > { %3976 = vmatpush3.msra.mxu1 %v4646_v41  ;;  %3979 = vmatprep.mubr.msk.f32.mxu1 %vm4152_vm5, %v4151_v26  ;;  %v2324_v41 = vld [vmem:[%s5893_s7 + $0x128] sm:$0xff] }
 0x35d   : > { %3977 = vmatprep.subr.mxu1 %v4151_v26  ;;  %3645 = vmatpush3.msra.mxu0 %v2299_v9 }
 0x35e   : > { %3978 = vmatpush3.msra.mxu1 %v4651_v44  ;;  %3646 = vmatprep.subr.mxu0 %v2314_v11  ;;  %v2306_v44 = vld [vmem:[%s5893_s7 + $0x98] sm:$0xff] }
 0x35f   : > { %3980 = vmatmul.mubr.msk.f32.vlgmr.msra.gmra.mxu1 %vm1585_vm6, %v2193_v59  ;;  %3673 = vmatprep.subr.mxu1 %v2350_v0  ;;  %v2321_v59 = vld [vmem:[%s5893_s7 + $0x110] sm:$0xff] }
 0x360   : > { %3674 = vmatpush3.msra.mxu1 %v2334_v2  ;;  %3647 = vmatpush3.msra.mxu0 %v2298_v13 }
 0x361   : > { %3675 = vmatprep.subr.mxu1 %v2349_v3  ;;  %3648 = vmatprep.subr.mxu0 %v2313_v15  ;;  %v2618_v15 = vld [vmem:[%s5895_s9 + $0xf8] sm:$0xff] }
 0x362   : > { %3676 = vmatpush3.msra.mxu1 %v2333_v5  ;;  %3649 = vmatpush3.msra.mxu0 %v2297_v17 }
 0x363   : > { %3677 = vmatprep.subr.mxu1 %v2348_v7  ;;  %3650 = vmatprep.subr.mxu0 %v2312_v19 }
 0x364   : > { %3678 = vmatpush3.msra.mxu1 %v2332_v8  ;;  %3651 = vmatpush3.msra.mxu0 %v2296_v21 }
 0x365   : > { %3679 = vmatprep.subr.mxu1 %v2347_v10  ;;  %3652 = vmatprep.subr.mxu0 %v2311_v24  ;;  %v2617_v24 = vld [vmem:[%s5895_s9 + $0xf0] sm:$0xff] }
 0x366   : > { %3680 = vmatpush3.msra.mxu1 %v2331_v12  ;;  %3653 = vmatpush3.msra.mxu0 %v2295_v23  ;;  %v2615_v23 = vld [vmem:[%s5895_s9 + $0xe0] sm:$0xff] }
 0x367   : > { %3681 = vmatprep.subr.mxu1 %v2346_v14  ;;  %3654 = vmatprep.subr.mxu0 %v2310_v28  ;;  %v2614_v28 = vld [vmem:[%s5895_s9 + $0xd8] sm:$0xff] }
 0x368   : > { %3682 = vmatpush3.msra.mxu1 %v2330_v16  ;;  %3655 = vmatpush3.msra.mxu0 %v2294_v30 }
 0x369   : > { %3683 = vmatprep.subr.mxu1 %v2345_v18  ;;  %3656 = vmatprep.subr.mxu0 %v2309_v32  ;;  %v2612_v32 = vld [vmem:[%s5895_s9 + $0xc8] sm:$0xff] }
 0x36a   : > { %3684 = vmatpush3.msra.mxu1 %v2329_v20  ;;  %3657 = vmatpush3.msra.mxu0 %v2293_v34 }
 0x36b   : > { %3685 = vmatprep.subr.mxu1 %v2344_v22  ;;  %3658 = vmatprep.subr.mxu0 %v2308_v36  ;;  %v2611_v36 = vld [vmem:[%s5895_s9 + $0xc0] sm:$0xff] }
 0x36c   : > { %3686 = vmatpush3.msra.mxu1 %v2328_v25  ;;  %3659 = vmatpush3.msra.mxu0 %v2292_v38  ;;  %v2616_v25 = vld [vmem:[%s5895_s9 + $0xe8] sm:$0xff]  ;;  %v2610_v38 = vld [vmem:[%s5895_s9 + $0xb8] sm:$0xff] }
 0x36d   : > { %3687 = vmatprep.subr.mxu1 %v2343_v27  ;;  %3660 = vmatprep.subr.mxu0 %v2307_v40  ;;  %v2356_v40 = vld [vmem:[%s5893_s7 + $0x228] sm:$0xff] }
 0x36e   : > { %3688 = vmatpush3.msra.mxu1 %v2327_v29  ;;  %3661 = vmatpush3.msra.mxu0 %v2291_v42  ;;  %v2607_v42 = vld [vmem:[%s5895_s9 + $0xa0] sm:$0xff] }
 0x36f   : > { %3689 = vmatprep.subr.mxu1 %v2342_v31  ;;  %3662 = vmatprep.subr.mxu0 %v2306_v44  ;;  %v2613_v31 = vld [vmem:[%s5895_s9 + $0xd0] sm:$0xff]  ;;  %v2606_v44 = vld [vmem:[%s5895_s9 + $0x98] sm:$0xff] }
 0x370   : > { %3690 = vmatpush3.msra.mxu1 %v2326_v33  ;;  %3663 = vmatpush3.msra.mxu0 %v2290_v46  ;;  %v2354_v46 = vld [vmem:[%s5893_s7 + $0x218] sm:$0xff] }
 0x371   : > { %3691 = vmatprep.subr.mxu1 %v2341_v35  ;;  %3664 = vmatprep.subr.mxu0 %v2305_v48  ;;  %v2358_v35 = vld [vmem:[%s5893_s7 + $0x238] sm:$0xff]  ;;  %v2603_v48 = vld [vmem:[%s5895_s9 + $0x80] sm:$0xff] }
 0x372   : > { %3692 = vmatpush3.msra.mxu1 %v2325_v37  ;;  %3665 = vmatpush3.msra.mxu0 %v2289_v50  ;;  %v2357_v37 = vld [vmem:[%s5893_s7 + $0x230] sm:$0xff]  ;;  %v2602_v50 = vld [vmem:[%s5895_s9 + $0x78] sm:$0xff] }
 0x373   : > { %3693 = vmatprep.subr.mxu1 %v2340_v39  ;;  %3666 = vmatprep.subr.mxu0 %v2304_v51  ;;  %v2609_v39 = vld [vmem:[%s5895_s9 + $0xb0] sm:$0xff] }
 0x374   : > { %3694 = vmatpush3.msra.mxu1 %v2324_v41  ;;  %3667 = vmatpush3.msra.mxu0 %v2288_v55  ;;  %v2608_v41 = vld [vmem:[%s5895_s9 + $0xa8] sm:$0xff]  ;;  %v2601_v51 = vld [vmem:[%s5895_s9 + $0x70] sm:$0xff]  ;;  %v2351_v55 = vld [vmem:[%s5893_s7 + $0x200] sm:$0xff] }
 0x375   : > { %3695 = vmatprep.subr.mxu1 %v2339_v43  ;;  %3668 = vmatprep.subr.mxu0 %v2303_v58  ;;  %v2355_v43 = vld [vmem:[%s5893_s7 + $0x220] sm:$0xff]  ;;  %v2681_v58 = vld [vmem:[%s5895_s9 + $0x2f0] sm:$0xff] }
 0x376   : > { %3696 = vmatpush3.msra.mxu1 %v2323_v45  ;;  %3669 = vmatpush3.msra.mxu0 %v2287_v60  ;;  %v2605_v45 = vld [vmem:[%s5895_s9 + $0x90] sm:$0xff]  ;;  %v2680_v60 = vld [vmem:[%s5895_s9 + $0x2e8] sm:$0xff] }
 0x377   : > { %3697 = vmatprep.subr.mxu1 %v2338_v47  ;;  %3982 = vmatprep.subr.mxu0 %v4151_v26  ;;  %v2604_v47 = vld [vmem:[%s5895_s9 + $0x88] sm:$0xff] }
 0x378   : > { %3698 = vmatpush3.msra.mxu1 %v2322_v49  ;;  %v2353_v49 = vld [vmem:[%s5893_s7 + $0x210] sm:$0xff] }
 0x379   : > { %3699 = vmatprep.subr.mxu1 %v2337_v56  ;;  %v2598_v56 = vld [vmem:[%s5895_s9 + $0x58] sm:$0xff] }
 0x37a   : > { %3700 = vmatpush3.msra.mxu1 %v2321_v59  ;;  %v2597_v59 = vld [vmem:[%s5895_s9 + $0x50] sm:$0xff] }
 0x37b   : > { %3701 = vmatprep.subr.mxu1 %v2336_v62  ;;  %v2679_v62 = vld [vmem:[%s5895_s9 + $0x2e0] sm:$0xff] }
 0x37c   : > { %3702 = vmatpush3.msra.mxu1 %v2320_v63  ;;  %v2595_v63 = vld [vmem:[%s5895_s9 + $0x40] sm:$0xff] }
 0x37d   : > { %3703 = vmatprep.subr.mxu1 %v2335_v1  ;;  %v2594_v1 = vld [vmem:[%s5895_s9 + $0x38] sm:$0xff] }
 0x37e   : > { %3704 = vmatpush3.msra.mxu1 %v2319_v4  ;;  %v2676_v4 = vld [vmem:[%s5895_s9 + $0x2c8] sm:$0xff] }
 0x37f   : > { %2887 = vmatprep.subr.mxu1 %v2618_v15  ;;  %v2587_v15 = vld [vmem:[%s5895_s9] sm:$0xff] }
 0x405   : > { %v4896_v52 = vpop.f32.mrf.mxu1 }
 0x407   : > { %v3925_v53 = vpop.f32.mrf.mxu1  ;;  %v2035_v54 = vpop.f32.mrf.mxu0 }
 0x408   : > { %v2600_v53 = vld [vmem:[%s5895_s9 + $0x68] sm:$0xff] }
 0x409   : > { %v3960_v57 = vpop.f32.mrf.mxu0 }
 0x40a   : > { %v1731_v61 = vpop.f32.mrf.mxu1  ;;  %v2682_v57 = vld [vmem:[%s5895_s9 + $0x2f8] sm:$0xff] }
 0x40c   : > { %v3932_v0 = vpop.f32.mrf.mxu1 }
 0x40d   : > { %v2187_v2 = vpop.f32.mrf.mxu0  ;;  %v2678_v0 = vld [vmem:[%s5895_s9 + $0x2d8] sm:$0xff] }
 0x40e   : > { %v4081_v3 = vpack.i.bf16 %v2035_v54, %v2187_v2  ;;  %v2599_v54 = vld [vmem:[%s5895_s9 + $0x60] sm:$0xff]  ;;  %v2677_v2 = vld [vmem:[%s5895_s9 + $0x2d0] sm:$0xff] }
 0x40f   : > { %v1807_v5 = vpop.f32.mrf.mxu1  ;;  %v3974_v6 = vpop.f32.mrf.mxu0 }
 0x410   : > { %4082 = vrot.lane.b32.xlu1 %v4081_v3, %s5906_s30  ;;  %v2593_v3 = vld [vmem:[%s5895_s9 + $0x30] sm:$0xff]  ;;  %v2675_v6 = vld [vmem:[%s5895_s9 + $0x2c0] sm:$0xff] }
 0x411   : > { %v3939_v7 = vpop.f32.mrf.mxu1 }
 0x412   : > { %v2591_v7 = vld [vmem:[%s5895_s9 + $0x20] sm:$0xff] }
 0x413   : > { %v1883_v8 = vpop.f32.mrf.mxu1 }
 0x414   : > { %v4076_v9 = vpack.i.bf16 %v1731_v61, %v1883_v8  ;;  %v2596_v61 = vld [vmem:[%s5895_s9 + $0x48] sm:$0xff]  ;;  %v2674_v8 = vld [vmem:[%s5895_s9 + $0x2b8] sm:$0xff] }
 0x415   : > { %v3946_v10 = vpop.f32.mrf.mxu1 }
 0x416   : > { %4077 = vrot.lane.b32.xlu0 %v4076_v9, %s5906_s30  ;;  %v2590_v9 = vld [vmem:[%s5895_s9 + $0x18] sm:$0xff]  ;;  %v2673_v10 = vld [vmem:[%s5895_s9 + $0x2b0] sm:$0xff]  ;;  %s379_s30 = scalar_lea.vmem [#allocation2], %s3345_s24 }
 0x417   : > { %v1959_v11 = vpop.f32.mrf.mxu1  ;;  %s3282_s25 = sshll.u32 %s379_s30, 4  ;;  %s3283_s25 = int_to_ptr.vmem [resolvable:$true] %s3282_s25 }
 0x418   : > { %s4086_s15 = scalar_lea.vmem %s3283_s25, 32  ;;  %p4093_p0 = scmp.lt.s32.totalorder %s3283_s25, %s4091_s1 }
 0x419   : > { %v3953_v12 = vpop.f32.mrf.mxu1  ;;  %p4087_p11 = scmp.ne.s32.totalorder %s3283_s25, %s4086_s15  ;;  %p4094_p1 = scmp.lt.s32.totalorder %s4092_s21, %s4086_s15 }
 0x41a   : > { %v2672_v12 = vld [vmem:[%s5895_s9 + $0x2a8] sm:$0xff] }
 0x41b   : > { %v2111_v13 = vpop.f32.mrf.mxu1  ;;  %p4088_p12 = pnand %p4087_p11, %p4253_p5  ;;  %p4095_p2 = por %p4094_p1, %p4093_p0 }
 0x41d   : > { %v3967_v14 = vpop.f32.mrf.mxu1  ;;  %p4089_p13 = pneg %p4088_p12 }
 0x41e   : > { %v2671_v14 = vld [vmem:[%s5895_s9 + $0x2a0] sm:$0xff] }
 0x41f   : > { %v4931_v16 = vpop.f32.mrf.mxu1  ;;  %p4096_p3 = pnand %p4095_p2, %p4089_p13 }
 0x421   : > { %v3981_v17 = vpop.f32.mrf.mxu1 }
 0x422   : > { %v2650_v17 = vld [vmem:[%s5895_s9 + $0x1f8] sm:$0xff] }
 0x482   : > { %v4083_v18 = vpop.permute.xlu1 %4082 }
 0x483   : > { %v4085_v19 = vunpack.i.h.bf16 %v4083_v18  ;;  %v4084_v20 = vunpack.i.l.bf16 %v4083_v18  ;;  %v2669_v18 = vld [vmem:[%s5895_s9 + $0x290] sm:$0xff] }
 0x485   : > { %v2286_v21 = vsel %vm550_vm2, %v2111_v13, %v4084_v20  ;;  %v2285_v22 = vsel %vm550_vm2, %v1959_v11, %v4085_v19  ;;  %v2589_v11 = vld [vmem:[%s5895_s9 + $0x10] sm:$0xff]  ;;  %v2588_v13 = vld [vmem:[%s5895_s9 + $0x8] sm:$0xff] }
 0x486   : > { %2503 = vmatprep.mubr.f32.mxu1 %v2286_v21  ;;  %v2649_v19 = vld [vmem:[%s5895_s9 + $0x1f0] sm:$0xff]  ;;  %v2668_v20 = vld [vmem:[%s5895_s9 + $0x288] sm:$0xff] }
 0x487   : > { %2504 = vmatmul.mubr.f32.vlgmr.msra.gmra.mxu1 %v2285_v22  ;;  %v2648_v21 = vld [vmem:[%s5895_s9 + $0x1e8] sm:$0xff]  ;;  %v2667_v22 = vld [vmem:[%s5895_s9 + $0x280] sm:$0xff] }
 0x488   : > { %v4078_v27 = vpop.permute.xlu0 %4077  ;;  %2888 = vmatpush1.msra.mxu1 %v2617_v24  ;;  %2951 = vmatprep.mubr.f32.mxu1 %v4151_v26  ;;  %v2647_v24 = vld [vmem:[%s5895_s9 + $0x1e0] sm:$0xff] }
 0x489   : > { %v4080_v29 = vunpack.i.h.bf16 %v4078_v27  ;;  %v4079_v30 = vunpack.i.l.bf16 %v4078_v27  ;;  %2889 = vmatprep.subr.mxu1 %v2616_v25  ;;  %v2666_v25 = vld [vmem:[%s5895_s9 + $0x278] sm:$0xff]  ;;  %v2665_v27 = vld [vmem:[%s5895_s9 + $0x270] sm:$0xff] }
 0x48a   : > { %2890 = vmatpush1.msra.mxu1 %v2615_v23  ;;  %v2646_v23 = vld [vmem:[%s5895_s9 + $0x1d8] sm:$0xff] }
 0x48b   : > { %v2284_v33 = vsel %vm550_vm2, %v1807_v5, %v4079_v30  ;;  %v2283_v34 = vsel %vm550_vm2, %v4896_v52, %v4080_v29  ;;  %2891 = vmatprep.subr.mxu1 %v2614_v28  ;;  %v2352_v52 = vld [vmem:[%s5893_s7 + $0x208] sm:$0xff]  ;;  %v2645_v28 = vld [vmem:[%s5895_s9 + $0x1d0] sm:$0xff] }
 0x48c   : > { %2433 = vmatprep.mubr.f32.mxu0 %v2284_v33  ;;  %2892 = vmatpush1.msra.mxu1 %v2613_v31  ;;  %v2592_v5 = vld [vmem:[%s5895_s9 + $0x28] sm:$0xff]  ;;  %v2663_v31 = vld [vmem:[%s5895_s9 + $0x260] sm:$0xff]  ;;  %v2662_v33 = vld [vmem:[%s5895_s9 + $0x258] sm:$0xff] }
 0x48d   : > { %2434 = vmatmul.mubr.f32.vlgmr.msra.gmra.mxu0 %v2283_v34  ;;  %2893 = vmatprep.subr.mxu1 %v2612_v32  ;;  %v2664_v29 = vld [vmem:[%s5895_s9 + $0x268] sm:$0xff]  ;;  %v2643_v32 = vld [vmem:[%s5895_s9 + $0x1c0] sm:$0xff]  ;;  %v2642_v34 = vld [vmem:[%s5895_s9 + $0x1b8] sm:$0xff] }
 0x48e   : > { %3983 = vmatpush3.msra.mxu0 %v2358_v35  ;;  %3998 = vmatprep.mubr.msk.f32.mxu0 %vm4152_vm5, %v4151_v26  ;;  %v2644_v30 = vld [vmem:[%s5895_s9 + $0x1c8] sm:$0xff]  ;;  %v2661_v35 = vld [vmem:[%s5895_s9 + $0x250] sm:$0xff] }
 0x48f   : > { %3984 = vmatprep.subr.mxu0 %v4151_v26  ;;  %2894 = vmatpush1.msra.mxu1 %v2611_v36  ;;  %v2641_v36 = vld [vmem:[%s5895_s9 + $0x1b0] sm:$0xff] }
 0x490   : > { %3985 = vmatpush3.msra.mxu0 %v2357_v37  ;;  %2895 = vmatprep.subr.mxu1 %v2610_v38  ;;  %v2660_v37 = vld [vmem:[%s5895_s9 + $0x248] sm:$0xff] }
 0x491   : > { %3986 = vmatprep.subr.mxu0 %v4151_v26  ;;  %2896 = vmatpush1.msra.mxu1 %v2609_v39  ;;  %v2640_v38 = vld [vmem:[%s5895_s9 + $0x1a8] sm:$0xff]  ;;  %v2659_v39 = vld [vmem:[%s5895_s9 + $0x240] sm:$0xff] }
 0x492   : > { %3987 = vmatpush3.msra.mxu0 %v2356_v40  ;;  %2897 = vmatprep.subr.mxu1 %v2608_v41  ;;  %v2639_v40 = vld [vmem:[%s5895_s9 + $0x1a0] sm:$0xff]  ;;  %v2658_v41 = vld [vmem:[%s5895_s9 + $0x238] sm:$0xff] }
 0x493   : > { %3988 = vmatprep.subr.mxu0 %v4151_v26  ;;  %2898 = vmatpush1.msra.mxu1 %v2607_v42  ;;  %v2638_v42 = vld [vmem:[%s5895_s9 + $0x198] sm:$0xff] }
 0x494   : > { %3989 = vmatpush3.msra.mxu0 %v2355_v43  ;;  %2899 = vmatprep.subr.mxu1 %v2606_v44  ;;  %v2657_v43 = vld [vmem:[%s5895_s9 + $0x230] sm:$0xff] }
 0x495   : > { %3990 = vmatprep.subr.mxu0 %v4151_v26  ;;  %2900 = vmatpush1.msra.mxu1 %v2605_v45  ;;  %v2637_v44 = vld [vmem:[%s5895_s9 + $0x190] sm:$0xff]  ;;  %v2656_v45 = vld [vmem:[%s5895_s9 + $0x228] sm:$0xff] }
 0x496   : > { %3991 = vmatpush3.msra.mxu0 %v2354_v46  ;;  %2901 = vmatprep.subr.mxu1 %v2604_v47  ;;  %v2636_v46 = vld [vmem:[%s5895_s9 + $0x188] sm:$0xff]  ;;  %v2655_v47 = vld [vmem:[%s5895_s9 + $0x220] sm:$0xff] }
 0x497   : > { %3992 = vmatprep.subr.mxu0 %v4151_v26  ;;  %2902 = vmatpush1.msra.mxu1 %v2603_v48  ;;  %v2635_v48 = vld [vmem:[%s5895_s9 + $0x180] sm:$0xff] }
 0x498   : > { %3993 = vmatpush3.msra.mxu0 %v2353_v49  ;;  %2903 = vmatprep.subr.mxu1 %v2602_v50  ;;  %v2654_v49 = vld [vmem:[%s5895_s9 + $0x218] sm:$0xff] }
 0x499   : > { %3994 = vmatprep.subr.mxu0 %v4151_v26  ;;  %2904 = vmatpush1.msra.mxu1 %v2601_v51  ;;  %v2634_v50 = vld [vmem:[%s5895_s9 + $0x178] sm:$0xff]  ;;  %v2653_v51 = vld [vmem:[%s5895_s9 + $0x210] sm:$0xff] }
 0x49a   : > { %3995 = vmatpush3.msra.mxu0 %v2352_v52  ;;  %2905 = vmatprep.subr.mxu1 %v2600_v53  ;;  %v2633_v52 = vld [vmem:[%s5895_s9 + $0x170] sm:$0xff]  ;;  %v2652_v53 = vld [vmem:[%s5895_s9 + $0x208] sm:$0xff] }
 0x49b   : > { %3996 = vmatprep.subr.mxu0 %v4151_v26  ;;  %2906 = vmatpush1.msra.mxu1 %v2599_v54  ;;  %v2632_v54 = vld [vmem:[%s5895_s9 + $0x168] sm:$0xff] }
 0x49c   : > { %3997 = vmatpush3.msra.mxu0 %v2351_v55  ;;  %2907 = vmatprep.subr.mxu1 %v2598_v56  ;;  %v2651_v55 = vld [vmem:[%s5895_s9 + $0x200] sm:$0xff] }
 0x49d   : > { %3999 = vmatmul.mubr.msk.f32.vlgmr.msra.gmra.mxu0 %vm550_vm2, %v4931_v16  ;;  %2958 = vmatprep.subr.mxu0 %v2682_v57  ;;  %v2670_v16 = vld [vmem:[%s5895_s9 + $0x298] sm:$0xff]  ;;  %v2631_v56 = vld [vmem:[%s5895_s9 + $0x160] sm:$0xff] }
 0x49e   : > { %2959 = vmatpush1.msra.mxu0 %v2681_v58  ;;  %2908 = vmatpush1.msra.mxu1 %v2597_v59  ;;  %v2714_v57 = vld [vmem:[%s5895_s9 + $0x3f8] sm:$0xff]  ;;  %v2713_v59 = vld [vmem:[%s5895_s9 + $0x3f0] sm:$0xff] }
 0x49f   : > { %2960 = vmatprep.subr.mxu0 %v2680_v60  ;;  %2909 = vmatprep.subr.mxu1 %v2596_v61  ;;  %v2630_v58 = vld [vmem:[%s5895_s9 + $0x158] sm:$0xff]  ;;  %v2629_v60 = vld [vmem:[%s5895_s9 + $0x150] sm:$0xff]  ;;  %v2712_v61 = vld [vmem:[%s5895_s9 + $0x3e8] sm:$0xff] }
 0x4a0   : > { %2961 = vmatpush1.msra.mxu0 %v2679_v62  ;;  %2910 = vmatpush1.msra.mxu1 %v2595_v63  ;;  %v2628_v62 = vld [vmem:[%s5895_s9 + $0x148] sm:$0xff]  ;;  %v2711_v63 = vld [vmem:[%s5895_s9 + $0x3e0] sm:$0xff] }
 0x4a1   : > { %2962 = vmatprep.subr.mxu0 %v2678_v0  ;;  %2911 = vmatprep.subr.mxu1 %v2594_v1  ;;  %v2627_v0 = vld [vmem:[%s5895_s9 + $0x140] sm:$0xff]  ;;  %v2710_v1 = vld [vmem:[%s5895_s9 + $0x3d8] sm:$0xff] }
 0x4a2   : > { %2963 = vmatpush1.msra.mxu0 %v2677_v2  ;;  %2912 = vmatpush1.msra.mxu1 %v2593_v3  ;;  %v2626_v2 = vld [vmem:[%s5895_s9 + $0x138] sm:$0xff]  ;;  %v2709_v3 = vld [vmem:[%s5895_s9 + $0x3d0] sm:$0xff] }
 0x4a3   : > { %2964 = vmatprep.subr.mxu0 %v2676_v4  ;;  %2913 = vmatprep.subr.mxu1 %v2592_v5  ;;  %v2625_v4 = vld [vmem:[%s5895_s9 + $0x130] sm:$0xff]  ;;  %v2708_v5 = vld [vmem:[%s5895_s9 + $0x3c8] sm:$0xff] }
 0x4a4   : > { %2965 = vmatpush1.msra.mxu0 %v2675_v6  ;;  %2914 = vmatpush1.msra.mxu1 %v2591_v7  ;;  %v2624_v6 = vld [vmem:[%s5895_s9 + $0x128] sm:$0xff]  ;;  %v2707_v7 = vld [vmem:[%s5895_s9 + $0x3c0] sm:$0xff] }
 0x4a5   : > { %2966 = vmatprep.subr.mxu0 %v2674_v8  ;;  %2915 = vmatprep.subr.mxu1 %v2590_v9  ;;  %v2623_v8 = vld [vmem:[%s5895_s9 + $0x120] sm:$0xff]  ;;  %v2706_v9 = vld [vmem:[%s5895_s9 + $0x3b8] sm:$0xff] }
 0x4a6   : > { %2967 = vmatpush1.msra.mxu0 %v2673_v10  ;;  %2916 = vmatpush1.msra.mxu1 %v2589_v11  ;;  %v2622_v10 = vld [vmem:[%s5895_s9 + $0x118] sm:$0xff]  ;;  %v2705_v11 = vld [vmem:[%s5895_s9 + $0x3b0] sm:$0xff] }
 0x4a7   : > { %2968 = vmatprep.subr.mxu0 %v2672_v12  ;;  %2917 = vmatprep.subr.mxu1 %v2588_v13  ;;  %v2621_v12 = vld [vmem:[%s5895_s9 + $0x110] sm:$0xff]  ;;  %v2704_v13 = vld [vmem:[%s5895_s9 + $0x3a8] sm:$0xff] }
 0x4a8   : > { %2969 = vmatpush1.msra.mxu0 %v2671_v14  ;;  %2918 = vmatpush1.msra.mxu1 %v2587_v15  ;;  %v2620_v14 = vld [vmem:[%s5895_s9 + $0x108] sm:$0xff]  ;;  %v2703_v15 = vld [vmem:[%s5895_s9 + $0x3a0] sm:$0xff] }
 0x4a9   : > { %2970 = vmatprep.subr.mxu0 %v2670_v16  ;;  %2919 = vmatprep.subr.mxu1 %v2650_v17  ;;  %v2619_v16 = vld [vmem:[%s5895_s9 + $0x100] sm:$0xff]  ;;  %v2702_v17 = vld [vmem:[%s5895_s9 + $0x398] sm:$0xff] }
 0x4aa   : > { %2971 = vmatpush1.msra.mxu0 %v2669_v18  ;;  %2920 = vmatpush2.msra.mxu1 %v2649_v19  ;;  %v2701_v18 = vld [vmem:[%s5895_s9 + $0x390] sm:$0xff]  ;;  %v2746_v19 = vld [vmem:[%s5895_s9 + $0x4f8] sm:$0xff] }
 0x4ab   : > { %2972 = vmatprep.subr.mxu0 %v2668_v20  ;;  %2921 = vmatprep.subr.mxu1 %v2648_v21  ;;  %v2700_v20 = vld [vmem:[%s5895_s9 + $0x388] sm:$0xff]  ;;  %v2699_v21 = vld [vmem:[%s5895_s9 + $0x380] sm:$0xff] }
 0x4ac   : > { %2973 = vmatpush1.msra.mxu0 %v2667_v22  ;;  %2922 = vmatpush2.msra.mxu1 %v2647_v24  ;;  %v2745_v22 = vld [vmem:[%s5895_s9 + $0x4f0] sm:$0xff]  ;;  %v2698_v24 = vld [vmem:[%s5895_s9 + $0x378] sm:$0xff] }
 0x4ad   : > { %2974 = vmatprep.subr.mxu0 %v2666_v25  ;;  %2923 = vmatprep.subr.mxu1 %v2646_v23  ;;  %v2744_v25 = vld [vmem:[%s5895_s9 + $0x4e8] sm:$0xff]  ;;  %v2697_v23 = vld [vmem:[%s5895_s9 + $0x370] sm:$0xff] }
 0x4ae   : > { %2975 = vmatpush1.msra.mxu0 %v2665_v27  ;;  %2924 = vmatpush2.msra.mxu1 %v2645_v28  ;;  %v2743_v27 = vld [vmem:[%s5895_s9 + $0x4e0] sm:$0xff]  ;;  %v2696_v28 = vld [vmem:[%s5895_s9 + $0x368] sm:$0xff] }
 0x4af   : > { %2976 = vmatprep.subr.mxu0 %v2664_v29  ;;  %2925 = vmatprep.subr.mxu1 %v2644_v30  ;;  %v2742_v29 = vld [vmem:[%s5895_s9 + $0x4d8] sm:$0xff]  ;;  %v2695_v30 = vld [vmem:[%s5895_s9 + $0x360] sm:$0xff] }
 0x4b0   : > { %2977 = vmatpush1.msra.mxu0 %v2663_v31  ;;  %2926 = vmatpush2.msra.mxu1 %v2643_v32  ;;  %v2741_v31 = vld [vmem:[%s5895_s9 + $0x4d0] sm:$0xff]  ;;  %v2694_v32 = vld [vmem:[%s5895_s9 + $0x358] sm:$0xff] }
 0x4b1   : > { %2978 = vmatprep.subr.mxu0 %v2662_v33  ;;  %2927 = vmatprep.subr.mxu1 %v2642_v34  ;;  %v2740_v33 = vld [vmem:[%s5895_s9 + $0x4c8] sm:$0xff]  ;;  %v2693_v34 = vld [vmem:[%s5895_s9 + $0x350] sm:$0xff] }
 0x4b2   : > { %2979 = vmatpush1.msra.mxu0 %v2661_v35  ;;  %2928 = vmatpush2.msra.mxu1 %v2641_v36  ;;  %v2739_v35 = vld [vmem:[%s5895_s9 + $0x4c0] sm:$0xff]  ;;  %v2692_v36 = vld [vmem:[%s5895_s9 + $0x348] sm:$0xff] }
 0x4b3   : > { %2980 = vmatprep.subr.mxu0 %v2660_v37  ;;  %2929 = vmatprep.subr.mxu1 %v2640_v38  ;;  %v2738_v37 = vld [vmem:[%s5895_s9 + $0x4b8] sm:$0xff]  ;;  %v2691_v38 = vld [vmem:[%s5895_s9 + $0x340] sm:$0xff] }
 0x4b4   : > { %2981 = vmatpush1.msra.mxu0 %v2659_v39  ;;  %2930 = vmatpush2.msra.mxu1 %v2639_v40  ;;  %v2737_v39 = vld [vmem:[%s5895_s9 + $0x4b0] sm:$0xff]  ;;  %v2690_v40 = vld [vmem:[%s5895_s9 + $0x338] sm:$0xff] }
 0x4b5   : > { %2982 = vmatprep.subr.mxu0 %v2658_v41  ;;  %2931 = vmatprep.subr.mxu1 %v2638_v42  ;;  %v2736_v41 = vld [vmem:[%s5895_s9 + $0x4a8] sm:$0xff]  ;;  %v2689_v42 = vld [vmem:[%s5895_s9 + $0x330] sm:$0xff] }
 0x4b6   : > { %2983 = vmatpush1.msra.mxu0 %v2657_v43  ;;  %2932 = vmatpush2.msra.mxu1 %v2637_v44  ;;  %v2735_v43 = vld [vmem:[%s5895_s9 + $0x4a0] sm:$0xff]  ;;  %v2688_v44 = vld [vmem:[%s5895_s9 + $0x328] sm:$0xff] }
 0x4b7   : > { %2984 = vmatprep.subr.mxu0 %v2656_v45  ;;  %2933 = vmatprep.subr.mxu1 %v2636_v46  ;;  %v2734_v45 = vld [vmem:[%s5895_s9 + $0x498] sm:$0xff]  ;;  %v2687_v46 = vld [vmem:[%s5895_s9 + $0x320] sm:$0xff] }
 0x4b8   : > { %2985 = vmatpush1.msra.mxu0 %v2655_v47  ;;  %2934 = vmatpush2.msra.mxu1 %v2635_v48  ;;  %v2733_v47 = vld [vmem:[%s5895_s9 + $0x490] sm:$0xff]  ;;  %v2686_v48 = vld [vmem:[%s5895_s9 + $0x318] sm:$0xff] }
 0x4b9   : > { %2986 = vmatprep.subr.mxu0 %v2654_v49  ;;  %2935 = vmatprep.subr.mxu1 %v2634_v50  ;;  %v2732_v49 = vld [vmem:[%s5895_s9 + $0x488] sm:$0xff]  ;;  %v2685_v50 = vld [vmem:[%s5895_s9 + $0x310] sm:$0xff] }
 0x4ba   : > { %2987 = vmatpush1.msra.mxu0 %v2653_v51  ;;  %2936 = vmatpush2.msra.mxu1 %v2633_v52  ;;  %v2731_v51 = vld [vmem:[%s5895_s9 + $0x480] sm:$0xff]  ;;  %v2684_v52 = vld [vmem:[%s5895_s9 + $0x308] sm:$0xff] }
 0x4bb   : > { %2988 = vmatprep.subr.mxu0 %v2652_v53  ;;  %2937 = vmatprep.subr.mxu1 %v2632_v54  ;;  %v2730_v53 = vld [vmem:[%s5895_s9 + $0x478] sm:$0xff]  ;;  %v2683_v54 = vld [vmem:[%s5895_s9 + $0x300] sm:$0xff] }
 0x4bc   : > { %2989 = vmatpush1.msra.mxu0 %v2651_v55  ;;  %2938 = vmatpush2.msra.mxu1 %v2631_v56  ;;  %v2729_v55 = vld [vmem:[%s5895_s9 + $0x470] sm:$0xff]  ;;  %v2810_v56 = vld [vmem:[%s5895_s9 + $0x6f8] sm:$0xff] }
 0x4bd   : > { %2990 = vmatprep.subr.mxu0 %v2714_v57  ;;  %2939 = vmatprep.subr.mxu1 %v2630_v58  ;;  %v2809_v57 = vld [vmem:[%s5895_s9 + $0x6f0] sm:$0xff]  ;;  %v2728_v58 = vld [vmem:[%s5895_s9 + $0x468] sm:$0xff] }
 0x4be   : > { %2991 = vmatpush2.msra.mxu0 %v2713_v59  ;;  %2940 = vmatpush2.msra.mxu1 %v2629_v60  ;;  %v2808_v59 = vld [vmem:[%s5895_s9 + $0x6e8] sm:$0xff]  ;;  %v2727_v60 = vld [vmem:[%s5895_s9 + $0x460] sm:$0xff] }
 0x4bf   : > { %2992 = vmatprep.subr.mxu0 %v2712_v61  ;;  %2941 = vmatprep.subr.mxu1 %v2628_v62  ;;  %v2807_v61 = vld [vmem:[%s5895_s9 + $0x6e0] sm:$0xff]  ;;  %v2726_v62 = vld [vmem:[%s5895_s9 + $0x458] sm:$0xff] }
 0x4c0   : > { %2993 = vmatpush2.msra.mxu0 %v2711_v63  ;;  %2942 = vmatpush2.msra.mxu1 %v2627_v0  ;;  %v2806_v63 = vld [vmem:[%s5895_s9 + $0x6d8] sm:$0xff]  ;;  %v2725_v0 = vld [vmem:[%s5895_s9 + $0x450] sm:$0xff] }
 0x4c1   : > { %2994 = vmatprep.subr.mxu0 %v2710_v1  ;;  %2943 = vmatprep.subr.mxu1 %v2626_v2  ;;  %v2805_v1 = vld [vmem:[%s5895_s9 + $0x6d0] sm:$0xff]  ;;  %v2724_v2 = vld [vmem:[%s5895_s9 + $0x448] sm:$0xff] }
 0x4c2   : > { %2995 = vmatpush2.msra.mxu0 %v2709_v3  ;;  %2944 = vmatpush2.msra.mxu1 %v2625_v4  ;;  %v2804_v3 = vld [vmem:[%s5895_s9 + $0x6c8] sm:$0xff]  ;;  %v2723_v4 = vld [vmem:[%s5895_s9 + $0x440] sm:$0xff] }
 0x4c3   : > { %2996 = vmatprep.subr.mxu0 %v2708_v5  ;;  %2945 = vmatprep.subr.mxu1 %v2624_v6  ;;  %v2803_v5 = vld [vmem:[%s5895_s9 + $0x6c0] sm:$0xff]  ;;  %v2722_v6 = vld [vmem:[%s5895_s9 + $0x438] sm:$0xff] }
 0x4c4   : > { %2997 = vmatpush2.msra.mxu0 %v2707_v7  ;;  %2946 = vmatpush2.msra.mxu1 %v2623_v8  ;;  %v2802_v7 = vld [vmem:[%s5895_s9 + $0x6b8] sm:$0xff]  ;;  %v2721_v8 = vld [vmem:[%s5895_s9 + $0x430] sm:$0xff] }
 0x4c5   : > { %2998 = vmatprep.subr.mxu0 %v2706_v9  ;;  %2947 = vmatprep.subr.mxu1 %v2622_v10  ;;  %v2801_v9 = vld [vmem:[%s5895_s9 + $0x6b0] sm:$0xff]  ;;  %v2720_v10 = vld [vmem:[%s5895_s9 + $0x428] sm:$0xff] }
 0x4c6   : > { %2999 = vmatpush2.msra.mxu0 %v2705_v11  ;;  %2948 = vmatpush2.msra.mxu1 %v2621_v12  ;;  %v2800_v11 = vld [vmem:[%s5895_s9 + $0x6a8] sm:$0xff]  ;;  %v2719_v12 = vld [vmem:[%s5895_s9 + $0x420] sm:$0xff] }
 0x4c7   : > { %3000 = vmatprep.subr.mxu0 %v2704_v13  ;;  %2949 = vmatprep.subr.mxu1 %v2620_v14  ;;  %v2799_v13 = vld [vmem:[%s5895_s9 + $0x6a0] sm:$0xff]  ;;  %v2718_v14 = vld [vmem:[%s5895_s9 + $0x418] sm:$0xff] }
 0x4c8   : > { %3001 = vmatpush2.msra.mxu0 %v2703_v15  ;;  %2950 = vmatpush2.msra.mxu1 %v2619_v16  ;;  %v2798_v15 = vld [vmem:[%s5895_s9 + $0x698] sm:$0xff]  ;;  %v2717_v16 = vld [vmem:[%s5895_s9 + $0x410] sm:$0xff] }
 0x4c9   : > { %3002 = vmatprep.subr.mxu0 %v2702_v17  ;;  %2952 = vmatmul.mubr.f32.vlgmr.msra.gmra.mxu1 %v4151_v26  ;;  %v2797_v17 = vld [vmem:[%s5895_s9 + $0x690] sm:$0xff] }
 0x4ca   : > { %3003 = vmatpush2.msra.mxu0 %v2701_v18  ;;  %3029 = vmatprep.subr.mxu1 %v2746_v19  ;;  %v2716_v18 = vld [vmem:[%s5895_s9 + $0x408] sm:$0xff] }
 0x4cb   : > { %3004 = vmatprep.subr.mxu0 %v2700_v20  ;;  %3022 = vmatprep.mubr.f32.mxu0 %v4151_v26  ;;  %v2796_v19 = vld [vmem:[%s5895_s9 + $0x688] sm:$0xff]  ;;  %v2715_v20 = vld [vmem:[%s5895_s9 + $0x400] sm:$0xff] }
 0x4cc   : > { %3005 = vmatpush2.msra.mxu0 %v2699_v21  ;;  %3030 = vmatpush1.msra.mxu1 %v2745_v22  ;;  %v2795_v21 = vld [vmem:[%s5895_s9 + $0x680] sm:$0xff]  ;;  %v2778_v22 = vld [vmem:[%s5895_s9 + $0x5f8] sm:$0xff] }
 0x4cd   : > { %3006 = vmatprep.subr.mxu0 %v2698_v24  ;;  %3031 = vmatprep.subr.mxu1 %v2744_v25  ;;  %v2794_v24 = vld [vmem:[%s5895_s9 + $0x678] sm:$0xff]  ;;  %v2777_v25 = vld [vmem:[%s5895_s9 + $0x5f0] sm:$0xff] }
 0x4ce   : > { %3007 = vmatpush2.msra.mxu0 %v2697_v23  ;;  %3032 = vmatpush1.msra.mxu1 %v2743_v27  ;;  %v2793_v23 = vld [vmem:[%s5895_s9 + $0x670] sm:$0xff]  ;;  %v2776_v27 = vld [vmem:[%s5895_s9 + $0x5e8] sm:$0xff] }
 0x4cf   : > { %3008 = vmatprep.subr.mxu0 %v2696_v28  ;;  %3033 = vmatprep.subr.mxu1 %v2742_v29  ;;  %v2792_v28 = vld [vmem:[%s5895_s9 + $0x668] sm:$0xff]  ;;  %v2775_v29 = vld [vmem:[%s5895_s9 + $0x5e0] sm:$0xff] }
 0x4d0   : > { %3009 = vmatpush2.msra.mxu0 %v2695_v30  ;;  %3034 = vmatpush1.msra.mxu1 %v2741_v31  ;;  %v2791_v30 = vld [vmem:[%s5895_s9 + $0x660] sm:$0xff]  ;;  %v2774_v31 = vld [vmem:[%s5895_s9 + $0x5d8] sm:$0xff] }
 0x4d1   : > { %3010 = vmatprep.subr.mxu0 %v2694_v32  ;;  %3035 = vmatprep.subr.mxu1 %v2740_v33  ;;  %v2790_v32 = vld [vmem:[%s5895_s9 + $0x658] sm:$0xff]  ;;  %v2773_v33 = vld [vmem:[%s5895_s9 + $0x5d0] sm:$0xff] }
 0x4d2   : > { %3011 = vmatpush2.msra.mxu0 %v2693_v34  ;;  %3036 = vmatpush1.msra.mxu1 %v2739_v35  ;;  %v2789_v34 = vld [vmem:[%s5895_s9 + $0x650] sm:$0xff]  ;;  %v2772_v35 = vld [vmem:[%s5895_s9 + $0x5c8] sm:$0xff] }
 0x4d3   : > { %3012 = vmatprep.subr.mxu0 %v2692_v36  ;;  %3037 = vmatprep.subr.mxu1 %v2738_v37  ;;  %v2788_v36 = vld [vmem:[%s5895_s9 + $0x648] sm:$0xff]  ;;  %v2771_v37 = vld [vmem:[%s5895_s9 + $0x5c0] sm:$0xff] }
 0x4d4   : > { %3013 = vmatpush2.msra.mxu0 %v2691_v38  ;;  %3038 = vmatpush1.msra.mxu1 %v2737_v39  ;;  %v2787_v38 = vld [vmem:[%s5895_s9 + $0x640] sm:$0xff]  ;;  %v2770_v39 = vld [vmem:[%s5895_s9 + $0x5b8] sm:$0xff] }
 0x4d5   : > { %3014 = vmatprep.subr.mxu0 %v2690_v40  ;;  %3039 = vmatprep.subr.mxu1 %v2736_v41  ;;  %v2786_v40 = vld [vmem:[%s5895_s9 + $0x638] sm:$0xff]  ;;  %v2769_v41 = vld [vmem:[%s5895_s9 + $0x5b0] sm:$0xff] }
 0x4d6   : > { %3015 = vmatpush2.msra.mxu0 %v2689_v42  ;;  %3040 = vmatpush1.msra.mxu1 %v2735_v43  ;;  %v2785_v42 = vld [vmem:[%s5895_s9 + $0x630] sm:$0xff]  ;;  %v2768_v43 = vld [vmem:[%s5895_s9 + $0x5a8] sm:$0xff] }
 0x4d7   : > { %3016 = vmatprep.subr.mxu0 %v2688_v44  ;;  %3041 = vmatprep.subr.mxu1 %v2734_v45  ;;  %v2784_v44 = vld [vmem:[%s5895_s9 + $0x628] sm:$0xff]  ;;  %v2767_v45 = vld [vmem:[%s5895_s9 + $0x5a0] sm:$0xff] }
 0x4d8   : > { %3017 = vmatpush2.msra.mxu0 %v2687_v46  ;;  %3042 = vmatpush1.msra.mxu1 %v2733_v47  ;;  %v2783_v46 = vld [vmem:[%s5895_s9 + $0x620] sm:$0xff]  ;;  %v2766_v47 = vld [vmem:[%s5895_s9 + $0x598] sm:$0xff] }
 0x4d9   : > { %3018 = vmatprep.subr.mxu0 %v2686_v48  ;;  %3043 = vmatprep.subr.mxu1 %v2732_v49  ;;  %v2782_v48 = vld [vmem:[%s5895_s9 + $0x618] sm:$0xff]  ;;  %v2765_v49 = vld [vmem:[%s5895_s9 + $0x590] sm:$0xff] }
 0x4da   : > { %3019 = vmatpush2.msra.mxu0 %v2685_v50  ;;  %3044 = vmatpush1.msra.mxu1 %v2731_v51  ;;  %v2781_v50 = vld [vmem:[%s5895_s9 + $0x610] sm:$0xff]  ;;  %v2764_v51 = vld [vmem:[%s5895_s9 + $0x588] sm:$0xff] }
 0x4db   : > { %3020 = vmatprep.subr.mxu0 %v2684_v52  ;;  %3045 = vmatprep.subr.mxu1 %v2730_v53  ;;  %v2780_v52 = vld [vmem:[%s5895_s9 + $0x608] sm:$0xff]  ;;  %v2763_v53 = vld [vmem:[%s5895_s9 + $0x580] sm:$0xff] }
 0x4dc   : > { %3021 = vmatpush2.msra.mxu0 %v2683_v54  ;;  %3046 = vmatpush1.msra.mxu1 %v2729_v55  ;;  %v2779_v54 = vld [vmem:[%s5895_s9 + $0x600] sm:$0xff]  ;;  %v2762_v55 = vld [vmem:[%s5895_s9 + $0x578] sm:$0xff] }
 0x4dd   : > { %3023 = vmatmul.mubr.f32.vlgmr.msra.gmra.mxu0 %v4151_v26  ;;  %3100 = vmatprep.subr.mxu0 %v2810_v56  ;;  %v2842_v56 = vld [vmem:[%s5895_s9 + $0x7f8] sm:$0xff] }
 0x4de   : > { %3101 = vmatpush1.msra.mxu0 %v2809_v57  ;;  %3047 = vmatprep.subr.mxu1 %v2728_v58  ;;  %v2761_v57 = vld [vmem:[%s5895_s9 + $0x570] sm:$0xff] }
 0x4df   : > { %3102 = vmatprep.subr.mxu0 %v2808_v59  ;;  %3048 = vmatpush1.msra.mxu1 %v2727_v60  ;;  %v2841_v58 = vld [vmem:[%s5895_s9 + $0x7f0] sm:$0xff]  ;;  %v2760_v59 = vld [vmem:[%s5895_s9 + $0x568] sm:$0xff] }
 0x4e0   : > { %3103 = vmatpush1.msra.mxu0 %v2807_v61  ;;  %3049 = vmatprep.subr.mxu1 %v2726_v62  ;;  %v2840_v60 = vld [vmem:[%s5895_s9 + $0x7e8] sm:$0xff]  ;;  %v2759_v61 = vld [vmem:[%s5895_s9 + $0x560] sm:$0xff] }
 0x4e1   : > { %3104 = vmatprep.subr.mxu0 %v2806_v63  ;;  %3050 = vmatpush1.msra.mxu1 %v2725_v0  ;;  %v2839_v62 = vld [vmem:[%s5895_s9 + $0x7e0] sm:$0xff]  ;;  %v2758_v63 = vld [vmem:[%s5895_s9 + $0x558] sm:$0xff] }
 0x4e2   : > { %3105 = vmatpush1.msra.mxu0 %v2805_v1  ;;  %3051 = vmatprep.subr.mxu1 %v2724_v2  ;;  %v2838_v0 = vld [vmem:[%s5895_s9 + $0x7d8] sm:$0xff]  ;;  %v2757_v1 = vld [vmem:[%s5895_s9 + $0x550] sm:$0xff] }
 0x4e3   : > { %3106 = vmatprep.subr.mxu0 %v2804_v3  ;;  %3052 = vmatpush1.msra.mxu1 %v2723_v4  ;;  %v2837_v2 = vld [vmem:[%s5895_s9 + $0x7d0] sm:$0xff]  ;;  %v2756_v3 = vld [vmem:[%s5895_s9 + $0x548] sm:$0xff] }
 0x4e4   : > { %3107 = vmatpush1.msra.mxu0 %v2803_v5  ;;  %3053 = vmatprep.subr.mxu1 %v2722_v6  ;;  %v2836_v4 = vld [vmem:[%s5895_s9 + $0x7c8] sm:$0xff]  ;;  %v2755_v5 = vld [vmem:[%s5895_s9 + $0x540] sm:$0xff] }
 0x4e5   : > { %3108 = vmatprep.subr.mxu0 %v2802_v7  ;;  %3054 = vmatpush1.msra.mxu1 %v2721_v8  ;;  %v2835_v6 = vld [vmem:[%s5895_s9 + $0x7c0] sm:$0xff]  ;;  %v2754_v7 = vld [vmem:[%s5895_s9 + $0x538] sm:$0xff] }
 0x4e6   : > { %3109 = vmatpush1.msra.mxu0 %v2801_v9  ;;  %3055 = vmatprep.subr.mxu1 %v2720_v10  ;;  %v2834_v8 = vld [vmem:[%s5895_s9 + $0x7b8] sm:$0xff]  ;;  %v2753_v9 = vld [vmem:[%s5895_s9 + $0x530] sm:$0xff] }
 0x4e7   : > { %3110 = vmatprep.subr.mxu0 %v2800_v11  ;;  %3056 = vmatpush1.msra.mxu1 %v2719_v12  ;;  %v2833_v10 = vld [vmem:[%s5895_s9 + $0x7b0] sm:$0xff]  ;;  %v2752_v11 = vld [vmem:[%s5895_s9 + $0x528] sm:$0xff] }
 0x4e8   : > { %3111 = vmatpush1.msra.mxu0 %v2799_v13  ;;  %3057 = vmatprep.subr.mxu1 %v2718_v14  ;;  %v2832_v12 = vld [vmem:[%s5895_s9 + $0x7a8] sm:$0xff]  ;;  %v2751_v13 = vld [vmem:[%s5895_s9 + $0x520] sm:$0xff] }
 0x4e9   : > { %3112 = vmatprep.subr.mxu0 %v2798_v15  ;;  %3058 = vmatpush1.msra.mxu1 %v2717_v16  ;;  %v2831_v14 = vld [vmem:[%s5895_s9 + $0x7a0] sm:$0xff]  ;;  %v2750_v15 = vld [vmem:[%s5895_s9 + $0x518] sm:$0xff] }
 0x4ea   : > { %3113 = vmatpush1.msra.mxu0 %v2797_v17  ;;  %3059 = vmatprep.subr.mxu1 %v2716_v18  ;;  %v2830_v16 = vld [vmem:[%s5895_s9 + $0x798] sm:$0xff]  ;;  %v2749_v17 = vld [vmem:[%s5895_s9 + $0x510] sm:$0xff] }
 0x4eb   : > { %3114 = vmatprep.subr.mxu0 %v2796_v19  ;;  %3060 = vmatpush1.msra.mxu1 %v2715_v20  ;;  %v2829_v18 = vld [vmem:[%s5895_s9 + $0x790] sm:$0xff]  ;;  %v2748_v19 = vld [vmem:[%s5895_s9 + $0x508] sm:$0xff] }
 0x4ec   : > { %3115 = vmatpush1.msra.mxu0 %v2795_v21  ;;  %3061 = vmatprep.subr.mxu1 %v2778_v22  ;;  %v2828_v20 = vld [vmem:[%s5895_s9 + $0x788] sm:$0xff]  ;;  %v2747_v21 = vld [vmem:[%s5895_s9 + $0x500] sm:$0xff] }
 0x4ed   : > { %3116 = vmatprep.subr.mxu0 %v2794_v24  ;;  %3062 = vmatpush2.msra.mxu1 %v2777_v25  ;;  %v2827_v22 = vld [vmem:[%s5895_s9 + $0x780] sm:$0xff]  ;;  %v2874_v24 = vld [vmem:[%s5895_s9 + $0x8f8] sm:$0xff] }
 0x4ee   : > { %3117 = vmatpush1.msra.mxu0 %v2793_v23  ;;  %3063 = vmatprep.subr.mxu1 %v2776_v27  ;;  %v2826_v25 = vld [vmem:[%s5895_s9 + $0x778] sm:$0xff]  ;;  %v2825_v23 = vld [vmem:[%s5895_s9 + $0x770] sm:$0xff]  ;;  %v2824_v27 = vld [vmem:[%s5895_s9 + $0x768] sm:$0xff] }
 0x4ef   : > { %3118 = vmatprep.subr.mxu0 %v2792_v28  ;;  %3064 = vmatpush2.msra.mxu1 %v2775_v29  ;;  %v2823_v28 = vld [vmem:[%s5895_s9 + $0x760] sm:$0xff]  ;;  %v2822_v29 = vld [vmem:[%s5895_s9 + $0x758] sm:$0xff] }
 0x4f0   : > { %3119 = vmatpush1.msra.mxu0 %v2791_v30  ;;  %3065 = vmatprep.subr.mxu1 %v2774_v31  ;;  %v2821_v30 = vld [vmem:[%s5895_s9 + $0x750] sm:$0xff]  ;;  %v2820_v31 = vld [vmem:[%s5895_s9 + $0x748] sm:$0xff] }
 0x4f1   : > { %3120 = vmatprep.subr.mxu0 %v2790_v32  ;;  %3066 = vmatpush2.msra.mxu1 %v2773_v33  ;;  %v2819_v32 = vld [vmem:[%s5895_s9 + $0x740] sm:$0xff]  ;;  %v2818_v33 = vld [vmem:[%s5895_s9 + $0x738] sm:$0xff] }
 0x4f2   : > { %3121 = vmatpush1.msra.mxu0 %v2789_v34  ;;  %3067 = vmatprep.subr.mxu1 %v2772_v35  ;;  %v2817_v34 = vld [vmem:[%s5895_s9 + $0x730] sm:$0xff]  ;;  %v2816_v35 = vld [vmem:[%s5895_s9 + $0x728] sm:$0xff] }
 0x4f3   : > { %3122 = vmatprep.subr.mxu0 %v2788_v36  ;;  %3068 = vmatpush2.msra.mxu1 %v2771_v37  ;;  %v2815_v36 = vld [vmem:[%s5895_s9 + $0x720] sm:$0xff]  ;;  %v2814_v37 = vld [vmem:[%s5895_s9 + $0x718] sm:$0xff] }
 0x4f4   : > { %3123 = vmatpush1.msra.mxu0 %v2787_v38  ;;  %3069 = vmatprep.subr.mxu1 %v2770_v39  ;;  %v2813_v38 = vld [vmem:[%s5895_s9 + $0x710] sm:$0xff]  ;;  %v2812_v39 = vld [vmem:[%s5895_s9 + $0x708] sm:$0xff] }
 0x4f5   : > { %3124 = vmatprep.subr.mxu0 %v2786_v40  ;;  %3070 = vmatpush2.msra.mxu1 %v2769_v41  ;;  %v2811_v40 = vld [vmem:[%s5895_s9 + $0x700] sm:$0xff] }
 0x4f6   : > { %3125 = vmatpush1.msra.mxu0 %v2785_v42  ;;  %3071 = vmatprep.subr.mxu1 %v2768_v43 }
 0x4f7   : > { %3126 = vmatprep.subr.mxu0 %v2784_v44  ;;  %3072 = vmatpush2.msra.mxu1 %v2767_v45  ;;  %v3412_v45 = vld [vmem:[%s5894_s8] ss:$0 sm:$0xff] }
 0x4f8   : > { %3127 = vmatpush1.msra.mxu0 %v2783_v46  ;;  %3073 = vmatprep.subr.mxu1 %v2766_v47 }
 0x4f9   : > { %3128 = vmatprep.subr.mxu0 %v2782_v48  ;;  %3074 = vmatpush2.msra.mxu1 %v2765_v49 }
 0x4fa   : > { %3129 = vmatpush1.msra.mxu0 %v2781_v50  ;;  %3075 = vmatprep.subr.mxu1 %v2764_v51 }
 0x4fb   : > { %3130 = vmatprep.subr.mxu0 %v2780_v52  ;;  %3076 = vmatpush2.msra.mxu1 %v2763_v53 }
 0x4fc   : > { %3131 = vmatpush1.msra.mxu0 %v2779_v54  ;;  %3077 = vmatprep.subr.mxu1 %v2762_v55 }
 0x4fd   : > { %3132 = vmatprep.subr.mxu0 %v2842_v56  ;;  %3078 = vmatpush2.msra.mxu1 %v2761_v57  ;;  %v2873_v56 = vld [vmem:[%s5895_s9 + $0x8f0] sm:$0xff]  ;;  %v2872_v57 = vld [vmem:[%s5895_s9 + $0x8e8] sm:$0xff] }
 0x4fe   : > { %3133 = vmatpush2.msra.mxu0 %v2841_v58  ;;  %3079 = vmatprep.subr.mxu1 %v2760_v59  ;;  %v2871_v58 = vld [vmem:[%s5895_s9 + $0x8e0] sm:$0xff]  ;;  %v2870_v59 = vld [vmem:[%s5895_s9 + $0x8d8] sm:$0xff] }
 0x4ff   : > { %3134 = vmatprep.subr.mxu0 %v2840_v60  ;;  %3080 = vmatpush2.msra.mxu1 %v2759_v61  ;;  %v2869_v60 = vld [vmem:[%s5895_s9 + $0x8d0] sm:$0xff]  ;;  %v2868_v61 = vld [vmem:[%s5895_s9 + $0x8c8] sm:$0xff] }
 0x500   : > { %3135 = vmatpush2.msra.mxu0 %v2839_v62  ;;  %3081 = vmatprep.subr.mxu1 %v2758_v63  ;;  %v2867_v62 = vld [vmem:[%s5895_s9 + $0x8c0] sm:$0xff]  ;;  %v2865_v63 = vld [vmem:[%s5895_s9 + $0x8b0] sm:$0xff] }
 0x501   : > { %3136 = vmatprep.subr.mxu0 %v2838_v0  ;;  %3082 = vmatpush2.msra.mxu1 %v2757_v1  ;;  %v2864_v0 = vld [vmem:[%s5895_s9 + $0x8a8] sm:$0xff]  ;;  %v2863_v1 = vld [vmem:[%s5895_s9 + $0x8a0] sm:$0xff] }
 0x502   : > { %3137 = vmatpush2.msra.mxu0 %v2837_v2  ;;  %3083 = vmatprep.subr.mxu1 %v2756_v3  ;;  %v2862_v2 = vld [vmem:[%s5895_s9 + $0x898] sm:$0xff]  ;;  %v2861_v3 = vld [vmem:[%s5895_s9 + $0x890] sm:$0xff] }
 0x503   : > { %3138 = vmatprep.subr.mxu0 %v2836_v4  ;;  %3084 = vmatpush2.msra.mxu1 %v2755_v5  ;;  %v2860_v4 = vld [vmem:[%s5895_s9 + $0x888] sm:$0xff]  ;;  %v2859_v5 = vld [vmem:[%s5895_s9 + $0x880] sm:$0xff] }
 0x504   : > { %3139 = vmatpush2.msra.mxu0 %v2835_v6  ;;  %3085 = vmatprep.subr.mxu1 %v2754_v7  ;;  %v2858_v6 = vld [vmem:[%s5895_s9 + $0x878] sm:$0xff]  ;;  %v2857_v7 = vld [vmem:[%s5895_s9 + $0x870] sm:$0xff] }
 0x505   : > { %3140 = vmatprep.subr.mxu0 %v2834_v8  ;;  %3086 = vmatpush2.msra.mxu1 %v2753_v9  ;;  %v2856_v8 = vld [vmem:[%s5895_s9 + $0x868] sm:$0xff]  ;;  %v2855_v9 = vld [vmem:[%s5895_s9 + $0x860] sm:$0xff] }
 0x506   : > { %3141 = vmatpush2.msra.mxu0 %v2833_v10  ;;  %3087 = vmatprep.subr.mxu1 %v2752_v11  ;;  %v2854_v10 = vld [vmem:[%s5895_s9 + $0x858] sm:$0xff]  ;;  %v2853_v11 = vld [vmem:[%s5895_s9 + $0x850] sm:$0xff] }
 0x507   : > { %3142 = vmatprep.subr.mxu0 %v2832_v12  ;;  %3088 = vmatpush2.msra.mxu1 %v2751_v13  ;;  %v2852_v12 = vld [vmem:[%s5895_s9 + $0x848] sm:$0xff]  ;;  %v2851_v13 = vld [vmem:[%s5895_s9 + $0x840] sm:$0xff] }
 0x508   : > { %3143 = vmatpush2.msra.mxu0 %v2831_v14  ;;  %3089 = vmatprep.subr.mxu1 %v2750_v15  ;;  %v2850_v14 = vld [vmem:[%s5895_s9 + $0x838] sm:$0xff]  ;;  %v2849_v15 = vld [vmem:[%s5895_s9 + $0x830] sm:$0xff] }
 0x509   : > { %3144 = vmatprep.subr.mxu0 %v2830_v16  ;;  %3090 = vmatpush2.msra.mxu1 %v2749_v17  ;;  %v2848_v16 = vld [vmem:[%s5895_s9 + $0x828] sm:$0xff]  ;;  %v2847_v17 = vld [vmem:[%s5895_s9 + $0x820] sm:$0xff] }
 0x50a   : > { %3145 = vmatpush2.msra.mxu0 %v2829_v18  ;;  %3091 = vmatprep.subr.mxu1 %v2748_v19  ;;  %v2846_v18 = vld [vmem:[%s5895_s9 + $0x818] sm:$0xff]  ;;  %v2845_v19 = vld [vmem:[%s5895_s9 + $0x810] sm:$0xff] }
 0x50b   : > { %3146 = vmatprep.subr.mxu0 %v2828_v20  ;;  %3092 = vmatpush2.msra.mxu1 %v2747_v21  ;;  %v2844_v20 = vld [vmem:[%s5895_s9 + $0x808] sm:$0xff]  ;;  %v2843_v21 = vld [vmem:[%s5895_s9 + $0x800] sm:$0xff] }
 0x50c   : > { %3147 = vmatpush2.msra.mxu0 %v2827_v22  ;;  %3171 = vmatprep.subr.mxu1 %v2874_v24  ;;  %v2877_v24 = vlaneseq }
 0x50d   : > { %3148 = vmatprep.subr.mxu0 %v2826_v25 }
 0x50e   : > { %3149 = vmatpush2.msra.mxu0 %v2825_v23  ;;  %v2878_v25 = vshrl.u32 %v2877_v24, 7  ;;  %vm3264_vm7 = vcmp.lt.s32.totalorder %v2877_v24, 256 }
 0x50f   : > { %3150 = vmatprep.subr.mxu0 %v2824_v27  ;;  %v2875_v27 = vld [vmem:[%s5896_s10] sm:$0x3] }
 0x510   : > { %3151 = vmatpush2.msra.mxu0 %v2823_v28  ;;  %v2879_v23 = vsub.s32 0, %v2878_v25  ;;  %v2883_v28 = vsub.s32 1, %v2878_v25 }
 0x511   : > { %3152 = vmatprep.subr.mxu0 %v2822_v29 }
 0x512   : > { %3153 = vmatpush2.msra.mxu0 %v2821_v30  ;;  %v2880_v30 = vrot.slane %v2875_v27, %v2879_v23 }
 0x513   : > { %3154 = vmatprep.subr.mxu0 %v2820_v31  ;;  %v2884_v31 = vrot.slane %v2875_v27, %v2883_v28 }
 0x514   : > { %3155 = vmatpush2.msra.mxu0 %v2819_v32 }
 0x515   : > { %3156 = vmatprep.subr.mxu0 %v2818_v33 }
 0x516   : > { %3157 = vmatpush2.msra.mxu0 %v2817_v34 }
 0x517   : > { %3158 = vmatprep.subr.mxu0 %v2816_v35 }
 0x518   : > { %3159 = vmatpush2.msra.mxu0 %v2815_v36 }
 0x519   : > { %3160 = vmatprep.subr.mxu0 %v2814_v37 }
 0x51a   : > { %3161 = vmatpush2.msra.mxu0 %v2813_v38 }
 0x51b   : > { %3162 = vmatprep.subr.mxu0 %v2812_v39 }
 0x51c   : > { %3163 = vmatpush2.msra.mxu0 %v2811_v40 }
 0x547   : > { %v3705_v43 = vpop.f32.mrf.mxu1 }
 0x549   : > { %v3706_v46 = vpop.f32.mrf.mxu1 }
 0x54a   : > { %v3707_v48 = vadd.f32 %v3706_v46, %v3705_v43 }
 0x54d   : > { %v3670_v41 = vpop.f32.mrf.mxu0 }
 0x54f   : > { %v3671_v42 = vpop.f32.mrf.mxu0 }
 0x550   : > { %v3672_v44 = vadd.f32 %v3671_v42, %v3670_v41 }
 0x552   : > { %v2436_v47 = vadd.f32 %v3672_v44, %v3412_v45  ;;  %v4153_v44 = vmov 1966171168  }
 0x553   : > { %v3248_v45 = vunpack.c.l.s4 %v4153_v44 }
 0x554   : > { %v2506_v49 = vadd.f32 %v3707_v48, %v2436_v47 }
 0x55d   : > { %v2575_v50 = vpop.f32.mrf.mxu0 }
 0x55e   : > { %v2576_v51 = vadd.f32 %v2575_v50, %v2506_v49 }
 0x55f   : > { %v4000_v52 = vpop.f32.mrf.mxu0 }
 0x560   : > { %v5748_v53 = vmax.f32 %v2576_v51, 0.0  ;;  %v3249_v51 = vunpack.c.0.s8 %v3248_v45 }
 0x562   : > { %v2581_v54 = vrot.slane %v5748_v53, 1  ;;  %v2583_v55 = vrot.slane %v5748_v53, 2  ;;  %v2585_v22 = vrot.slane %v5748_v53, 3 }
 0x564   : > { %3093 = vmatprep.mubr.f32.mxu1 %v2581_v54  ;;  %3164 = vmatprep.mubr.f32.mxu0 %v2583_v55 }
 0x565   : > { %3094 = vmatmul.mubr.f32.vlgmr.msra.gmra.mxu1 %v5748_v53  ;;  %3165 = vmatmul.mubr.f32.vlgmr.msra.gmra.mxu0 %v4151_v26 }
 0x566   : > { %3172 = vmatpush1.msra.mxu1 %v2873_v56  ;;  %3235 = vmatprep.mubr.f32.mxu1 %v4151_v26  ;;  %v2866_v26 = vld [vmem:[%s5895_s9 + $0x8b8] sm:$0xff]  ;;  %v3252_v56 = vsub.s32 %v3249_v51, %v2878_v25 }
 0x567   : > { %3173 = vmatprep.subr.mxu1 %v2872_v57 }
 0x568   : > { %3174 = vmatpush1.msra.mxu1 %v2871_v58 }
 0x569   : > { %3175 = vmatprep.subr.mxu1 %v2870_v59 }
 0x56a   : > { %3176 = vmatpush1.msra.mxu1 %v2869_v60 }
 0x56b   : > { %3177 = vmatprep.subr.mxu1 %v2868_v61 }
 0x56c   : > { %3178 = vmatpush1.msra.mxu1 %v2867_v62 }
 0x56d   : > { %3179 = vmatprep.subr.mxu1 %v2866_v26 }
 0x56e   : > { %3180 = vmatpush1.msra.mxu1 %v2865_v63 }
 0x56f   : > { %3181 = vmatprep.subr.mxu1 %v2864_v0 }
 0x570   : > { %3182 = vmatpush1.msra.mxu1 %v2863_v1 }
 0x571   : > { %3183 = vmatprep.subr.mxu1 %v2862_v2 }
 0x572   : > { %3184 = vmatpush1.msra.mxu1 %v2861_v3 }
 0x573   : > { %3185 = vmatprep.subr.mxu1 %v2860_v4 }
 0x574   : > { %3186 = vmatpush1.msra.mxu1 %v2859_v5 }
 0x575   : > { %3187 = vmatprep.subr.mxu1 %v2858_v6 }
 0x576   : > { %3188 = vmatpush1.msra.mxu1 %v2857_v7 }
 0x577   : > { %3189 = vmatprep.subr.mxu1 %v2856_v8 }
 0x578   : > { %3190 = vmatpush1.msra.mxu1 %v2855_v9 }
 0x579   : > { %3191 = vmatprep.subr.mxu1 %v2854_v10 }
 0x57a   : > { %3192 = vmatpush1.msra.mxu1 %v2853_v11 }
 0x57b   : > { %3193 = vmatprep.subr.mxu1 %v2852_v12 }
 0x57c   : > { %3194 = vmatpush1.msra.mxu1 %v2851_v13 }
 0x57d   : > { %3195 = vmatprep.subr.mxu1 %v2850_v14 }
 0x57e   : > { %3196 = vmatpush1.msra.mxu1 %v2849_v15 }
 0x57f   : > { %3197 = vmatprep.subr.mxu1 %v2848_v16 }
 0x580   : > { %3198 = vmatpush1.msra.mxu1 %v2847_v17 }
 0x581   : > { %3199 = vmatprep.subr.mxu1 %v2846_v18 }
 0x582   : > { %3200 = vmatpush1.msra.mxu1 %v2845_v19 }
 0x583   : > { %3201 = vmatprep.subr.mxu1 %v2844_v20 }
 0x584   : > { %3202 = vmatpush1.msra.mxu1 %v2843_v21 }
 0x585   : > { %3236 = vmatmul.mubr.f32.vlgmr.msra.gmra.mxu1 %v2585_v22 }
 0x589   : > { %v2953_v29 = vpop.f32.mrf.mxu1 }
 0x58a   : > { %v2954_v34 = vadd.f32 %v2953_v29, %v2880_v30 }
 0x58b   : > { %v2955_v32 = vpop.f32.mrf.mxu1 }
 0x58c   : > { %v2956_v36 = vadd.f32 %v2955_v32, %v2884_v31 }
 0x59d   : > { %v3024_v33 = vpop.f32.mrf.mxu0 }
 0x59e   : > { %v3025_v38 = vadd.f32 %v3024_v33, %v2954_v34 }
 0x59f   : > { %v3026_v37 = vpop.f32.mrf.mxu0 }
 0x5a0   : > { %v3027_v41 = vadd.f32 %v3026_v37, %v2956_v36 }
 0x625   : > { %v3095_v35 = vpop.f32.mrf.mxu1  ;;  %v3166_v40 = vpop.f32.mrf.mxu0 }
 0x626   : > { %v3096_v42 = vadd.f32 %v3095_v35, %v3025_v38 }
 0x627   : > { %v3097_v39 = vpop.f32.mrf.mxu1  ;;  %v3168_v46 = vpop.f32.mrf.mxu0 }
 0x628   : > { %v3098_v43 = vadd.f32 %v3097_v39, %v3027_v41  ;;  %v3167_v47 = vadd.f32 %v3166_v40, %v3096_v42 }
 0x62a   : > { %v3169_v49 = vadd.f32 %v3168_v46, %v3098_v43 }
 0x645   : > { %v3237_v48 = vpop.f32.mrf.mxu1 }
 0x646   : > { %v3238_v50 = vadd.f32 %v3237_v48, %v3167_v47 }
 0x647   : > { %v3239_v52 = vpop.f32.mrf.mxu1 }
 0x648   : > { %v3240_v53 = vadd.f32 %v3239_v52, %v3169_v49  ;;  %v3242_v54 = vmax.f32 %v3238_v50, 0.0 }
 0x64a   : > { %v3243_v55 = vmax.f32 %v3240_v53, 0.0 }
 0x64c   : > { %v3246_v57 = vcombine.low %v3242_v54, %v3243_v55 }
 0x64e   : > { %v3253_v58 = vrot.slane %v3246_v57, %v3252_v56 }
 0x650   : > { %v3260_v59 = vrot.slane %v3253_v58, %v3252_v56 }
 0x652   : > { %3266 = vst.msk [vmem:[%s379_s30] sm:$0x3] %vm3264_vm7, %v3260_v59 }
 0x653   : > { %4099 = shalt.err (!%p4096_p3)
}
 0x654   : > { %s4100_s24 = scalar_lea.hbm %s3280_s13, 32  ;;  %s4104_s30 = scalar_lea.hbm %s5897_s11, 64 }
 0x655   : > { %p4101_p4 = scmp.ne.s32.totalorder %s3280_s13, %s4100_s24  ;;  %p4105_p9 = scmp.lt.s32.totalorder %s3280_s13, %s5897_s11 }
 0x656   : > { %p4106_p10 = scmp.lt.s32.totalorder %s4104_s30, %s4100_s24 }
 0x657   : > { %p4102_p7 = pnand %p4101_p4, %p4253_p5 }
 0x658   : > { %p4107_p11 = por %p4106_p10, %p4105_p9 }
 0x659   : > { %p4103_p8 = pneg %p4102_p7 }
 0x65b   : > { %p4108_p12 = pnand %p4107_p11, %p4103_p8 }
 0x65d   : > { %4111 = shalt.err (!%p4108_p12)
}
 0x65e   : > { %4001 = dma.vmem_to_hbm [thread:$0]  (%p4253_p5), %s3283_s25, 32, %s3280_s13, %s3268_s14  }
 0x65f PF: > { %p4007_p13 = scmp.ge.s32.totalorder %s4146_s20, 2  ;;  %s3294_s0 = sand.u32 1, %s4134_s17  }
 0x660   : > { %s3295_s1 = scalar_lea.sflag [#allocation3], %s3294_s0 }
 0x661   : > { %p4004_p0 = pnand %p4007_p13, %p4257_p6 }
 0x663   : > { %p4005_p1 = pneg %p4004_p0 }
 0x665   : > { %4129 = dma.done.wait (%p4005_p1), %s3295_s1, 32  }
 0x666   : > { %4131 = vsyncadd (%p4005_p1), %s3295_s1, 4294967264  ;;  %p21_p2 = scmp.ge.s32.totalorder %s4240_s23, 4   ;;  %s5907_s17 = smov %s4138_s18 }
 0x667   : > { %s5908_s18 = smov %s4142_s19  ;;  %s5909_s19 = smov %s4251_s26 }
 0x668   : > { %s5910_s20 = smov %s4240_s23  ;;  %23 = sbr.rel (!%p21_p2) target bundleno = 6 (0x6), region = 115 }
 0x66d   :  { %3300 = vsyncpa [#allocation3], 1 }
 0x66e   :  { %3302 = vsyncpa [#allocation3 + $0x1], 1 }

</bundles_post_ra>
